<compile_context>
chip_gen: v6e
topology: v6e:2x2x1
jax: 0.10.0
libtpu: 0.0.40
codegen_flags: <defaults>
</compile_context>

<pallas_src>
import math

import jax
import jax.numpy as jnp
from jax.experimental import pallas as pl
from jax.experimental.pallas import tpu as pltpu

HIDDEN = 64          # fixed by MLP([3, 64, out]) and MLP([out, 64, out])
BN_EPS = 1e-5
NEG_INF = -1e30


def _round_up(a, b):
    return (a + b - 1) // b * b


# ----------------------- fused pairwise / online-softmax kernel ---------------

def _pair_softmax_kernel(bias_ref, a_dst_ref, a_src_ref, x_lin_ref, pp_ref,
                         pb1_ref, pw2_ref, pb2_ref,
                         aw1_ref, ab1_ref, aw2_ref, ab2_ref,
                         w_out_ref, b_out_ref,
                         out_ref, m_sc, l_sc, acc_sc):
    """Grid point (t, s): target block t vs source tile s; online softmax over s."""
    f32, bf16 = jnp.float32, jnp.bfloat16
    TI, c_out = out_ref.shape
    TS = a_src_ref.shape[0]
    H = pb1_ref.shape[1]
    M = TI * TS
    t = pl.program_id(0)
    s = pl.program_id(1)
    ns = pl.num_programs(1)

    @pl.when(s == 0)
    def _():
        m_sc[...] = jnp.full((TI, c_out), -jnp.inf, f32)
        l_sc[...] = jnp.zeros((TI, c_out), f32)
        acc_sc[...] = jnp.zeros((TI, c_out), f32)

    def mxu(a, w_ref):
        # bf16 operands (MXU-native), f32 accumulate.
        return jnp.dot(a.astype(bf16), w_ref[...], preferred_element_type=f32)

    # Target / source rows of the pos_nn layer-1 projection (sliced in-kernel,
    # no duplicated per-step input streams).
    ti0 = pl.multiple_of(t * TI, TI)
    si0 = pl.multiple_of(s * TS, TS)
    pp_t = pp_ref[pl.ds(ti0, TI), :]                                   # (TI, H)
    pp_s = pp_ref[pl.ds(si0, TS), :]                                   # (TS, H)

    # pos_nn layer 1 via linearity: relu((pos_i - pos_j) @ W1 + b1) = relu(P_i - P_j + b1)
    h1 = jnp.maximum(pp_t[:, None, :] - pp_s[None, :, :]
                     + pb1_ref[...][None], 0.0)                        # (TI, TS, H)

    # pos_nn layer 2 on the MXU over the flattened pair axis; keep live value bf16.
    delta = jnp.maximum(mxu(h1.reshape(M, H), pw2_ref)
                        + pb2_ref[...], 0.0).astype(bf16)              # (M, c_out) bf16

    # attn_nn(alpha_dst_i - alpha_src_j + delta)
    ad_as = (a_dst_ref[...][:, None, :]
             - a_src_ref[...][None, :, :]).reshape(M, c_out)           # (M, c_out) f32
    a1 = jnp.maximum(mxu(ad_as + delta.astype(f32), aw1_ref)
                     + ab1_ref[...], 0.0).astype(bf16)                 # (M, H) bf16
    # Final attn layer (softmax logits) kept in f32 for accuracy.
    logits = jnp.maximum(
        jnp.dot(a1.astype(f32), aw2_ref[...], preferred_element_type=f32)
        + ab2_ref[...], 0.0).reshape(TI, TS, c_out)
    logits = logits + bias_ref[...][:, :, None]                        # masked logits

    # Online per-(target, channel) softmax over the source axis (PyG epsilon at end).
    m_new = jnp.maximum(m_sc[...], jnp.max(logits, axis=1))            # (TI, c_out)
    corr = jnp.exp(m_sc[...] - m_new)
    p = jnp.exp(logits - m_new[:, None, :])                            # (TI, TS, c_out)
    l_sc[...] = corr * l_sc[...] + jnp.sum(p, axis=1)
    msg = p * (x_lin_ref[...][None, :, :]
               + delta.reshape(TI, TS, c_out).astype(f32))
    acc_sc[...] = corr * acc_sc[...] + jnp.sum(msg, axis=1)
    m_sc[...] = m_new

    @pl.when(s == ns - 1)
    def _():
        conv = acc_sc[...] * pl.reciprocal(l_sc[...] + 1e-16, approx=True)
        out_ref[...] = jnp.maximum(
            jnp.dot(conv, w_out_ref[...], preferred_element_type=f32)
            + b_out_ref[...], 0.0)


# ------------------------------ tiling / budget --------------------------------

def _vmem_limit_bytes():
    cap = 64 << 20                                    # conservative default (v7x per-TC)
    try:
        info = pltpu.get_tpu_info()
        cap = int(getattr(info, "vmem_capacity_bytes", cap)) or cap
    except Exception:
        pass
    # ~3/4 of per-core VMEM; ~48 MiB on v7x, capped at 100 MiB on v5e/v6e.
    return max(32 << 20, min(cap * 3 // 4, 100 << 20))


def _choose_tiling(N, vmem_budget):
    if N <= 256:
        # One source tile; two target blocks so v7x's second TensorCore has work
        # (neutral on single-TC v5e/v6e).
        Np = _round_up(max(N, 16), 16)
        return Np, Np // 2, Np
    # Source-tiled online-softmax path: shrink TI until the lane-padded pairwise
    # working set (~5 live f32-equivalent (TI*TS, 128-lane) buffers) fits the budget.
    TS = 256
    Np = _round_up(N, TS)
    TI = 128
    while TI > 8 and 5 * TI * TS * 128 * 4 > vmem_budget // 2:
        TI //= 2
    return Np, TI, TS


# --------------------------------- wrapper --------------------------------------

def transformer_block_forward(params, x, pos, edge_index):
    N, _ = x.shape
    c_out = params["w_lin"].shape[1]
    f32, bf16 = jnp.float32, jnp.bfloat16

    vmem_limit = _vmem_limit_bytes()
    Np, TI, TS = _choose_tiling(N, vmem_limit)

    # ---- node-wise projections, hoisted out of the pairwise kernel (computed once) ----
    h = jax.nn.relu(x @ params["w_in"] + params["b_in"])               # lin_in + relu
    w_cat = jnp.concatenate(
        [params["w_lin"], params["w_src"], params["w_dst"]], axis=1)   # (c_in, 3*c_out)
    proj = h @ w_cat                                                   # one matmul
    x_lin, a_src, a_dst = jnp.split(proj, 3, axis=1)
    pp = pos @ params["pos_w1"]                                        # pos_nn layer-1 proj

    def pad_rows(a):
        p = Np - a.shape[0]
        return jnp.pad(a, ((0, p), (0, 0))) if p else a

    x_lin, a_src, a_dst, pp = map(pad_rows, (x_lin, a_src, a_dst, pp))

    # ---- dense edge mask (PyG add_self_loops semantics), 2D additive bias ----
    src, dst = edge_index[0], edge_index[1]
    adj = jnp.zeros((Np, Np), dtype=jnp.bool_).at[dst, src].set(True)  # adj[i, j]: j -> i
    eye = jnp.eye(Np, dtype=jnp.bool_)
    adj = (adj & ~eye) | eye                                           # padded rows self-attend
    bias = jnp.where(adj, 0.0, NEG_INF).astype(f32)                    # (Np, Np)

    def full(shape):
        n = len(shape)
        return pl.BlockSpec(shape, lambda t, s: (0,) * n)

    out = pl.pallas_call(
        _pair_softmax_kernel,
        grid=(Np // TI, Np // TS),
        in_specs=[
            pl.BlockSpec((TI, TS), lambda t, s: (t, s)),       # additive softmax mask
            pl.BlockSpec((TI, c_out), lambda t, s: (t, 0)),    # alpha_dst (targets)
            pl.BlockSpec((TS, c_out), lambda t, s: (s, 0)),    # alpha_src (sources)
            pl.BlockSpec((TS, c_out), lambda t, s: (s, 0)),    # lin(x)    (sources)
            full((Np, HIDDEN)),                                # pos @ pos_w1 (sliced in-kernel)
            full((1, HIDDEN)),                                 # pos_nn layer-1 bias (BN folded)
            full((HIDDEN, c_out)), full((1, c_out)),           # pos_nn layer 2 (bf16 W)
            full((c_out, HIDDEN)), full((1, HIDDEN)),          # attn_nn layer 1 (bf16 W)
            full((HIDDEN, c_out)), full((1, c_out)),           # attn_nn layer 2 (f32 W)
            full((c_out, c_out)), full((1, c_out)),            # lin_out
        ],
        out_specs=pl.BlockSpec((TI, c_out), lambda t, s: (t, 0)),
        out_shape=jax.ShapeDtypeStruct((Np, c_out), f32),
        scratch_shapes=[pltpu.VMEM((TI, c_out), jnp.float32),   # running max
                        pltpu.VMEM((TI, c_out), jnp.float32),   # running denom
                        pltpu.VMEM((TI, c_out), jnp.float32)],  # running weighted message
        compiler_params=pltpu.CompilerParams(
            dimension_semantics=("parallel", "arbitrary"),
            vmem_limit_bytes=vmem_limit),
    )(bias, a_dst, a_src, x_lin, pp,
      params["pos_b1"][None, :],
      params["pos_w2"].astype(bf16), params["pos_b2"][None, :],
      params["attn_w1"].astype(bf16), params["attn_b1"][None, :],
      params["attn_w2"], params["attn_b2"][None, :],
      params["w_out"], params["b_out"][None, :])

    return out[:N]


# ------------------------- parameter initialization --------------------------

def _fold_bn(w, b, num_features, eps=BN_EPS):
    """Fold a fresh (eval-mode) BatchNorm1d into the preceding Linear."""
    gamma = jnp.ones((num_features,), jnp.float32)
    beta = jnp.zeros((num_features,), jnp.float32)
    mean = jnp.zeros((num_features,), jnp.float32)
    var = jnp.ones((num_features,), jnp.float32)
    scale = gamma / jnp.sqrt(var + eps)
    return w * scale[None, :], b * scale + (beta - mean * scale)


def init_params(key, c_in, c_out):
    keys = jax.random.split(key, 16)

    def linear(kw, kb, fan_in, fan_out, bias=True):
        bound = 1.0 / math.sqrt(fan_in)
        w = jax.random.uniform(kw, (fan_in, fan_out), jnp.float32, -bound, bound)
        b = (jax.random.uniform(kb, (fan_out,), jnp.float32, -bound, bound)
             if bias else None)
        return w, b

    w_in, b_in = linear(keys[0], keys[1], c_in, c_in)
    w_out, b_out = linear(keys[2], keys[3], c_out, c_out)
    w_lin, _ = linear(keys[4], keys[4], c_in, c_out, bias=False)
    w_src, _ = linear(keys[5], keys[5], c_in, c_out, bias=False)
    w_dst, _ = linear(keys[6], keys[6], c_in, c_out, bias=False)

    pw1, pb1 = linear(keys[7], keys[8], 3, HIDDEN)
    pw2, pb2 = linear(keys[9], keys[10], HIDDEN, c_out)
    aw1, ab1 = linear(keys[11], keys[12], c_out, HIDDEN)
    aw2, ab2 = linear(keys[13], keys[14], HIDDEN, c_out)

    pw1, pb1 = _fold_bn(pw1, pb1, HIDDEN)
    pw2, pb2 = _fold_bn(pw2, pb2, c_out)
    aw1, ab1 = _fold_bn(aw1, ab1, HIDDEN)
    aw2, ab2 = _fold_bn(aw2, ab2, c_out)

    return dict(w_in=w_in, b_in=b_in, w_out=w_out, b_out=b_out,
                w_lin=w_lin, w_src=w_src, w_dst=w_dst,
                pos_w1=pw1, pos_b1=pb1, pos_w2=pw2, pos_b2=pb2,
                attn_w1=aw1, attn_b1=ab1, attn_w2=aw2, attn_b2=ab2)


# ----------------------------- pure-JAX reference ----------------------------

def reference_forward(params, x, pos, edge_index):
    N = x.shape[0]
    h = jax.nn.relu(x @ params["w_in"] + params["b_in"])
    x_lin = h @ params["w_lin"]
    a_src = h @ params["w_src"]
    a_dst = h @ params["w_dst"]

    src, dst = edge_index[0], edge_index[1]
    adj = jnp.zeros((N, N), dtype=jnp.bool_).at[dst, src].set(True)
    eye = jnp.eye(N, dtype=jnp.bool_)
    adj = (adj & ~eye) | eye

    rel = pos[:, None, :] - pos[None, :, :]                         # (i, j, 3)
    d = jax.nn.relu(rel @ params["pos_w1"] + params["pos_b1"])
    delta = jax.nn.relu(d @ params["pos_w2"] + params["pos_b2"])    # (N, N, C_out)
    alpha = a_dst[:, None, :] - a_src[None, :, :] + delta
    a = jax.nn.relu(alpha @ params["attn_w1"] + params["attn_b1"])
    a = jax.nn.relu(a @ params["attn_w2"] + params["attn_b2"])
    a = jnp.where(adj[:, :, None], a, NEG_INF)
    m = a.max(axis=1, keepdims=True)
    e = jnp.exp(a - m)
    w = e / (e.sum(axis=1, keepdims=True) + 1e-16)
    conv = jnp.sum(w * (x_lin[None, :, :] + delta), axis=1)
    return jax.nn.relu(conv @ params["w_out"] + params["b_out"])


# ----------------------------------- main ------------------------------------

if __name__ == "__main__":
    N, C_IN, C_OUT, E = 16, 8, 16, 40

    key = jax.random.PRNGKey(0)
    k_param, k_x, k_pos, k_src, k_dst = jax.random.split(key, 5)

    params = init_params(k_param, C_IN, C_OUT)
    x = jax.random.normal(k_x, (N, C_IN), dtype=jnp.float32)
    pos = jax.random.normal(k_pos, (N, 3), dtype=jnp.float32)
    src = jax.random.randint(k_src, (E,), 0, N, dtype=jnp.int32)
    dst = jax.random.randint(k_dst, (E,), 0, N, dtype=jnp.int32)
    edge_index = jnp.stack([src, dst], axis=0)

    out = transformer_block_forward(params, x, pos, edge_index)
    out = jax.block_until_ready(out)

    ref = jax.block_until_ready(reference_forward(params, x, pos, edge_index))
    err = float(jnp.max(jnp.abs(out - ref)))
    assert out.shape == (N, C_OUT), out.shape
    assert err < 2e-2, f"max abs error vs reference: {err}"

    print("KERNEL_OK")
</pallas_src>

<mosaic_0001>
module attributes {stable_mosaic.version = 11 : i64} {
  func.func @_pair_softmax_kernel(%arg0: i32, %arg1: i32, %arg2: memref<8x16xf32, #tpu.memory_space<vmem>>, %arg3: memref<8x16xf32, #tpu.memory_space<vmem>>, %arg4: memref<16x16xf32, #tpu.memory_space<vmem>>, %arg5: memref<16x16xf32, #tpu.memory_space<vmem>>, %arg6: memref<16x64xf32, #tpu.memory_space<vmem>>, %arg7: memref<1x64xf32, #tpu.memory_space<vmem>>, %arg8: memref<64x16xbf16, #tpu.memory_space<vmem>>, %arg9: memref<1x16xf32, #tpu.memory_space<vmem>>, %arg10: memref<16x64xbf16, #tpu.memory_space<vmem>>, %arg11: memref<1x64xf32, #tpu.memory_space<vmem>>, %arg12: memref<64x16xf32, #tpu.memory_space<vmem>>, %arg13: memref<1x16xf32, #tpu.memory_space<vmem>>, %arg14: memref<16x16xf32, #tpu.memory_space<vmem>>, %arg15: memref<1x16xf32, #tpu.memory_space<vmem>>, %arg16: memref<8x16xf32, #tpu.memory_space<vmem>>, %arg17: memref<8x16xf32, #tpu.memory_space<vmem>>, %arg18: memref<8x16xf32, #tpu.memory_space<vmem>>, %arg19: memref<8x16xf32, #tpu.memory_space<vmem>>) attributes {dimension_semantics = [#tpu.dimension_semantics<parallel>, #tpu.dimension_semantics<arbitrary>], iteration_bounds = array<i64: 2, 1>, scalar_prefetch = 0 : i64, scratch_operands = 3 : i64, tpu.core_type = #tpu.core_type<tc>, window_params = [{transform_indices = @transform_0, window_bounds = array<i64: 8, 16>}, {transform_indices = @transform_1, window_bounds = array<i64: 8, 16>}, {transform_indices = @transform_2, window_bounds = array<i64: 16, 16>}, {transform_indices = @transform_3, window_bounds = array<i64: 16, 16>}, {pipeline_mode = #tpu.pipeline_mode<synchronous>, transform_indices = @transform_4, window_bounds = array<i64: 16, 64>}, {pipeline_mode = #tpu.pipeline_mode<synchronous>, transform_indices = @transform_5, window_bounds = array<i64: 1, 64>}, {pipeline_mode = #tpu.pipeline_mode<synchronous>, transform_indices = @transform_6, window_bounds = array<i64: 64, 16>}, {pipeline_mode = #tpu.pipeline_mode<synchronous>, transform_indices = @transform_7, window_bounds = array<i64: 1, 16>}, {pipeline_mode = #tpu.pipeline_mode<synchronous>, transform_indices = @transform_8, window_bounds = array<i64: 16, 64>}, {pipeline_mode = #tpu.pipeline_mode<synchronous>, transform_indices = @transform_9, window_bounds = array<i64: 1, 64>}, {pipeline_mode = #tpu.pipeline_mode<synchronous>, transform_indices = @transform_10, window_bounds = array<i64: 64, 16>}, {pipeline_mode = #tpu.pipeline_mode<synchronous>, transform_indices = @transform_11, window_bounds = array<i64: 1, 16>}, {pipeline_mode = #tpu.pipeline_mode<synchronous>, transform_indices = @transform_12, window_bounds = array<i64: 16, 16>}, {pipeline_mode = #tpu.pipeline_mode<synchronous>, transform_indices = @transform_13, window_bounds = array<i64: 1, 16>}, {transform_indices = @transform_14, window_bounds = array<i64: 8, 16>}]} {
    %c0_i32 = arith.constant 0 : i32
    %0 = arith.cmpi eq, %arg1, %c0_i32 : i32
    %1 = arith.extui %0 : i1 to i32
    %c0_i32_0 = arith.constant 0 : i32
    %2 = arith.cmpi ne, %1, %c0_i32_0 : i32
    scf.if %2 {
      %cst_49 = arith.constant 0xFF800000 : f32
      %95 = vector.broadcast %cst_49 : f32 to vector<8x16xf32>
      %c0_50 = arith.constant 0 : index
      %c0_51 = arith.constant 0 : index
      %96 = vector.load %arg17[%c0_50, %c0_51] : memref<8x16xf32, #tpu.memory_space<vmem>>, vector<8x16xf32>
      tpu.vector_store %arg17[%c0_50, %c0_51], %95 {strides = array<i32>} : memref<8x16xf32, #tpu.memory_space<vmem>>, vector<8x16xf32>,
      %cst_52 = arith.constant 0.000000e+00 : f32
      %97 = vector.broadcast %cst_52 : f32 to vector<8x16xf32>
      %c0_53 = arith.constant 0 : index
      %c0_54 = arith.constant 0 : index
      %98 = vector.load %arg18[%c0_53, %c0_54] : memref<8x16xf32, #tpu.memory_space<vmem>>, vector<8x16xf32>
      tpu.vector_store %arg18[%c0_53, %c0_54], %97 {strides = array<i32>} : memref<8x16xf32, #tpu.memory_space<vmem>>, vector<8x16xf32>,
      %cst_55 = arith.constant 0.000000e+00 : f32
      %99 = vector.broadcast %cst_55 : f32 to vector<8x16xf32>
      %c0_56 = arith.constant 0 : index
      %c0_57 = arith.constant 0 : index
      %100 = vector.load %arg19[%c0_56, %c0_57] : memref<8x16xf32, #tpu.memory_space<vmem>>, vector<8x16xf32>
      tpu.vector_store %arg19[%c0_56, %c0_57], %99 {strides = array<i32>} : memref<8x16xf32, #tpu.memory_space<vmem>>, vector<8x16xf32>,
    } else {
    }
    %c8_i32 = arith.constant 8 : i32
    %3 = arith.muli %arg0, %c8_i32 : i32
    %4 = tpu.assume_multiple %3, 8 : i32
    %c16_i32 = arith.constant 16 : i32
    %5 = arith.muli %arg1, %c16_i32 : i32
    %6 = tpu.assume_multiple %5, 16 : i32
    %7 = arith.index_cast %4 : i32 to index
    %c0 = arith.constant 0 : index
    %8 = vector.load %arg6[%7, %c0] : memref<16x64xf32, #tpu.memory_space<vmem>>, vector<8x64xf32>
    %9 = arith.index_cast %6 : i32 to index
    %c0_1 = arith.constant 0 : index
    %10 = vector.load %arg6[%9, %c0_1] : memref<16x64xf32, #tpu.memory_space<vmem>>, vector<16x64xf32>
    %11 = vector.shape_cast %8 : vector<8x64xf32> to vector<8x1x64xf32>
    %12 = vector.shape_cast %10 : vector<16x64xf32> to vector<1x16x64xf32>
    %13 = vector.broadcast %11 : vector<8x1x64xf32> to vector<8x16x64xf32>
    %14 = vector.broadcast %12 : vector<1x16x64xf32> to vector<8x16x64xf32>
    %15 = arith.subf %13, %14 : vector<8x16x64xf32>
    %c0_2 = arith.constant 0 : index
    %c0_3 = arith.constant 0 : index
    %16 = vector.load %arg7[%c0_2, %c0_3] : memref<1x64xf32, #tpu.memory_space<vmem>>, vector<1x64xf32>
    %17 = vector.shape_cast %16 : vector<1x64xf32> to vector<1x1x64xf32>
    %18 = vector.broadcast %17 : vector<1x1x64xf32> to vector<8x16x64xf32>
    %19 = arith.addf %15, %18 : vector<8x16x64xf32>
    %cst = arith.constant 0.000000e+00 : f32
    %20 = vector.broadcast %cst : f32 to vector<8x16x64xf32>
    %21 = arith.maximumf %19, %20 : vector<8x16x64xf32>
    %22 = vector.shape_cast %21 : vector<8x16x64xf32> to vector<128x64xf32>
    %23 = arith.truncf %22 : vector<128x64xf32> to vector<128x64xbf16>
    %c0_4 = arith.constant 0 : index
    %c0_5 = arith.constant 0 : index
    %24 = vector.load %arg8[%c0_4, %c0_5] : memref<64x16xbf16, #tpu.memory_space<vmem>>, vector<64x16xbf16>
    %cst_6 = arith.constant dense<0.000000e+00> : vector<128x16xf32>
    %25 = tpu.matmul %23, %24, %cst_6 {dimension_numbers = #tpu.dot_dimension_numbers<[1], [0], [0], [1], [0, 0, 1, 1], [], []>} : vector<128x64xbf16>, vector<64x16xbf16>, vector<128x16xf32> -> vector<128x16xf32>
    %c0_7 = arith.constant 0 : index
    %c0_8 = arith.constant 0 : index
    %26 = vector.load %arg9[%c0_7, %c0_8] : memref<1x16xf32, #tpu.memory_space<vmem>>, vector<1x16xf32>
    %27 = vector.broadcast %26 : vector<1x16xf32> to vector<128x16xf32>
    %28 = arith.addf %25, %27 : vector<128x16xf32>
    %cst_9 = arith.constant 0.000000e+00 : f32
    %29 = vector.broadcast %cst_9 : f32 to vector<128x16xf32>
    %30 = arith.maximumf %28, %29 : vector<128x16xf32>
    %31 = arith.truncf %30 : vector<128x16xf32> to vector<128x16xbf16>
    %c0_10 = arith.constant 0 : index
    %c0_11 = arith.constant 0 : index
    %32 = vector.load %arg3[%c0_10, %c0_11] : memref<8x16xf32, #tpu.memory_space<vmem>>, vector<8x16xf32>
    %33 = vector.shape_cast %32 : vector<8x16xf32> to vector<8x1x16xf32>
    %c0_12 = arith.constant 0 : index
    %c0_13 = arith.constant 0 : index
    %34 = vector.load %arg4[%c0_12, %c0_13] : memref<16x16xf32, #tpu.memory_space<vmem>>, vector<16x16xf32>
    %35 = vector.shape_cast %34 : vector<16x16xf32> to vector<1x16x16xf32>
    %36 = vector.broadcast %33 : vector<8x1x16xf32> to vector<8x16x16xf32>
    %37 = vector.broadcast %35 : vector<1x16x16xf32> to vector<8x16x16xf32>
    %38 = arith.subf %36, %37 : vector<8x16x16xf32>
    %39 = vector.shape_cast %38 : vector<8x16x16xf32> to vector<128x16xf32>
    %40 = arith.extf %31 : vector<128x16xbf16> to vector<128x16xf32>
    %41 = arith.addf %39, %40 : vector<128x16xf32>
    %42 = arith.truncf %41 : vector<128x16xf32> to vector<128x16xbf16>
    %c0_14 = arith.constant 0 : index
    %c0_15 = arith.constant 0 : index
    %43 = vector.load %arg10[%c0_14, %c0_15] : memref<16x64xbf16, #tpu.memory_space<vmem>>, vector<16x64xbf16>
    %cst_16 = arith.constant dense<0.000000e+00> : vector<128x64xf32>
    %44 = tpu.matmul %42, %43, %cst_16 {dimension_numbers = #tpu.dot_dimension_numbers<[1], [0], [0], [1], [0, 0, 1, 1], [], []>} : vector<128x16xbf16>, vector<16x64xbf16>, vector<128x64xf32> -> vector<128x64xf32>
    %c0_17 = arith.constant 0 : index
    %c0_18 = arith.constant 0 : index
    %45 = vector.load %arg11[%c0_17, %c0_18] : memref<1x64xf32, #tpu.memory_space<vmem>>, vector<1x64xf32>
    %46 = vector.broadcast %45 : vector<1x64xf32> to vector<128x64xf32>
    %47 = arith.addf %44, %46 : vector<128x64xf32>
    %cst_19 = arith.constant 0.000000e+00 : f32
    %48 = vector.broadcast %cst_19 : f32 to vector<128x64xf32>
    %49 = arith.maximumf %47, %48 : vector<128x64xf32>
    %50 = arith.truncf %49 : vector<128x64xf32> to vector<128x64xbf16>
    %51 = arith.extf %50 : vector<128x64xbf16> to vector<128x64xf32>
    %c0_20 = arith.constant 0 : index
    %c0_21 = arith.constant 0 : index
    %52 = vector.load %arg12[%c0_20, %c0_21] : memref<64x16xf32, #tpu.memory_space<vmem>>, vector<64x16xf32>
    %cst_22 = arith.constant dense<0.000000e+00> : vector<128x16xf32>
    %53 = tpu.matmul %51, %52, %cst_22 {dimension_numbers = #tpu.dot_dimension_numbers<[1], [0], [0], [1], [0, 0, 1, 1], [], []>} : vector<128x64xf32>, vector<64x16xf32>, vector<128x16xf32> -> vector<128x16xf32>
    %c0_23 = arith.constant 0 : index
    %c0_24 = arith.constant 0 : index
    %54 = vector.load %arg13[%c0_23, %c0_24] : memref<1x16xf32, #tpu.memory_space<vmem>>, vector<1x16xf32>
    %55 = vector.broadcast %54 : vector<1x16xf32> to vector<128x16xf32>
    %56 = arith.addf %53, %55 : vector<128x16xf32>
    %cst_25 = arith.constant 0.000000e+00 : f32
    %57 = vector.broadcast %cst_25 : f32 to vector<128x16xf32>
    %58 = arith.maximumf %56, %57 : vector<128x16xf32>
    %59 = vector.shape_cast %58 : vector<128x16xf32> to vector<8x16x16xf32>
    %c0_26 = arith.constant 0 : index
    %c0_27 = arith.constant 0 : index
    %60 = vector.load %arg2[%c0_26, %c0_27] : memref<8x16xf32, #tpu.memory_space<vmem>>, vector<8x16xf32>
    %61 = vector.shape_cast %60 : vector<8x16xf32> to vector<8x16x1xf32>
    %62 = vector.broadcast %61 : vector<8x16x1xf32> to vector<8x16x16xf32>
    %63 = arith.addf %59, %62 : vector<8x16x16xf32>
    %c0_28 = arith.constant 0 : index
    %c0_29 = arith.constant 0 : index
    %64 = vector.load %arg17[%c0_28, %c0_29] : memref<8x16xf32, #tpu.memory_space<vmem>>, vector<8x16xf32>
    %cst_30 = arith.constant dense<0xFF800000> : vector<8x16xf32>
    %65 = vector.multi_reduction <maximumf>, %63, %cst_30 [1] : vector<8x16x16xf32> to vector<8x16xf32>
    %66 = arith.maximumf %64, %65 : vector<8x16xf32>
    %c0_31 = arith.constant 0 : index
    %c0_32 = arith.constant 0 : index
    %67 = vector.load %arg17[%c0_31, %c0_32] : memref<8x16xf32, #tpu.memory_space<vmem>>, vector<8x16xf32>
    %68 = arith.subf %67, %66 : vector<8x16xf32>
    %69 = math.exp %68 : vector<8x16xf32>
    %70 = vector.shape_cast %66 : vector<8x16xf32> to vector<8x1x16xf32>
    %71 = vector.broadcast %70 : vector<8x1x16xf32> to vector<8x16x16xf32>
    %72 = arith.subf %63, %71 : vector<8x16x16xf32>
    %73 = math.exp %72 : vector<8x16x16xf32>
    %c0_33 = arith.constant 0 : index
    %c0_34 = arith.constant 0 : index
    %74 = vector.load %arg18[%c0_33, %c0_34] : memref<8x16xf32, #tpu.memory_space<vmem>>, vector<8x16xf32>
    %75 = arith.mulf %69, %74 : vector<8x16xf32>
    %cst_35 = arith.constant dense<0.000000e+00> : vector<8x16xf32>
    %76 = vector.multi_reduction <add>, %73, %cst_35 [1] : vector<8x16x16xf32> to vector<8x16xf32>
    %77 = arith.addf %75, %76 : vector<8x16xf32>
    %c0_36 = arith.constant 0 : index
    %c0_37 = arith.constant 0 : index
    %78 = vector.load %arg18[%c0_36, %c0_37] : memref<8x16xf32, #tpu.memory_space<vmem>>, vector<8x16xf32>
    tpu.vector_store %arg18[%c0_36, %c0_37], %77 {strides = array<i32>} : memref<8x16xf32, #tpu.memory_space<vmem>>, vector<8x16xf32>,
    %c0_38 = arith.constant 0 : index
    %c0_39 = arith.constant 0 : index
    %79 = vector.load %arg5[%c0_38, %c0_39] : memref<16x16xf32, #tpu.memory_space<vmem>>, vector<16x16xf32>
    %80 = vector.shape_cast %79 : vector<16x16xf32> to vector<1x16x16xf32>
    %81 = vector.shape_cast %31 : vector<128x16xbf16> to vector<8x16x16xbf16>
    %82 = arith.extf %81 : vector<8x16x16xbf16> to vector<8x16x16xf32>
    %83 = vector.broadcast %80 : vector<1x16x16xf32> to vector<8x16x16xf32>
    %84 = arith.addf %83, %82 : vector<8x16x16xf32>
    %85 = arith.mulf %73, %84 : vector<8x16x16xf32>
    %c0_40 = arith.constant 0 : index
    %c0_41 = arith.constant 0 : index
    %86 = vector.load %arg19[%c0_40, %c0_41] : memref<8x16xf32, #tpu.memory_space<vmem>>, vector<8x16xf32>
    %87 = arith.mulf %69, %86 : vector<8x16xf32>
    %cst_42 = arith.constant dense<0.000000e+00> : vector<8x16xf32>
    %88 = vector.multi_reduction <add>, %85, %cst_42 [1] : vector<8x16x16xf32> to vector<8x16xf32>
    %89 = arith.addf %87, %88 : vector<8x16xf32>
    %c0_43 = arith.constant 0 : index
    %c0_44 = arith.constant 0 : index
    %90 = vector.load %arg19[%c0_43, %c0_44] : memref<8x16xf32, #tpu.memory_space<vmem>>, vector<8x16xf32>
    tpu.vector_store %arg19[%c0_43, %c0_44], %89 {strides = array<i32>} : memref<8x16xf32, #tpu.memory_space<vmem>>, vector<8x16xf32>,
    %c0_45 = arith.constant 0 : index
    %c0_46 = arith.constant 0 : index
    %91 = vector.load %arg17[%c0_45, %c0_46] : memref<8x16xf32, #tpu.memory_space<vmem>>, vector<8x16xf32>
    tpu.vector_store %arg17[%c0_45, %c0_46], %66 {strides = array<i32>} : memref<8x16xf32, #tpu.memory_space<vmem>>, vector<8x16xf32>,
    %c0_i32_47 = arith.constant 0 : i32
    %92 = arith.cmpi eq, %arg1, %c0_i32_47 : i32
    %93 = arith.extui %92 : i1 to i32
    %c0_i32_48 = arith.constant 0 : i32
    %94 = arith.cmpi ne, %93, %c0_i32_48 : i32
    scf.if %94 {
      %c0_49 = arith.constant 0 : index
      %c0_50 = arith.constant 0 : index
      %95 = vector.load %arg19[%c0_49, %c0_50] : memref<8x16xf32, #tpu.memory_space<vmem>>, vector<8x16xf32>
      %c0_51 = arith.constant 0 : index
      %c0_52 = arith.constant 0 : index
      %96 = vector.load %arg18[%c0_51, %c0_52] : memref<8x16xf32, #tpu.memory_space<vmem>>, vector<8x16xf32>
      %cst_53 = arith.constant 1.000000e-16 : f32
      %97 = vector.broadcast %cst_53 : f32 to vector<8x16xf32>
      %98 = arith.addf %96, %97 : vector<8x16xf32>
      %99 = tpu.reciprocal %98 {approx = true} : vector<8x16xf32> -> vector<8x16xf32>
      %100 = arith.mulf %95, %99 : vector<8x16xf32>
      %c0_54 = arith.constant 0 : index
      %c0_55 = arith.constant 0 : index
      %101 = vector.load %arg14[%c0_54, %c0_55] : memref<16x16xf32, #tpu.memory_space<vmem>>, vector<16x16xf32>
      %cst_56 = arith.constant dense<0.000000e+00> : vector<8x16xf32>
      %102 = tpu.matmul %100, %101, %cst_56 {dimension_numbers = #tpu.dot_dimension_numbers<[1], [0], [0], [1], [0, 0, 1, 1], [], []>} : vector<8x16xf32>, vector<16x16xf32>, vector<8x16xf32> -> vector<8x16xf32>
      %c0_57 = arith.constant 0 : index
      %c0_58 = arith.constant 0 : index
      %103 = vector.load %arg15[%c0_57, %c0_58] : memref<1x16xf32, #tpu.memory_space<vmem>>, vector<1x16xf32>
      %104 = vector.broadcast %103 : vector<1x16xf32> to vector<8x16xf32>
      %105 = arith.addf %102, %104 : vector<8x16xf32>
      %cst_59 = arith.constant 0.000000e+00 : f32
      %106 = vector.broadcast %cst_59 : f32 to vector<8x16xf32>
      %107 = arith.maximumf %105, %106 : vector<8x16xf32>
      %c0_60 = arith.constant 0 : index
      %c0_61 = arith.constant 0 : index
      %108 = vector.load %arg16[%c0_60, %c0_61] : memref<8x16xf32, #tpu.memory_space<vmem>>, vector<8x16xf32>
      tpu.vector_store %arg16[%c0_60, %c0_61], %107 {strides = array<i32>} : memref<8x16xf32, #tpu.memory_space<vmem>>, vector<8x16xf32>,
    } else {
    }
    return
  }
  func.func @transform_0(%arg0: i32, %arg1: i32) -> (i32, i32) {
    %c0_i32 = arith.constant 0 : i32
    return %arg0, %arg1 : i32, i32
  }
  func.func @transform_1(%arg0: i32, %arg1: i32) -> (i32, i32) {
    %c0_i32 = arith.constant 0 : i32
    %c0_i32_0 = arith.constant 0 : i32
    return %arg0, %c0_i32 : i32, i32
  }
  func.func @transform_2(%arg0: i32, %arg1: i32) -> (i32, i32) {
    %c0_i32 = arith.constant 0 : i32
    %c0_i32_0 = arith.constant 0 : i32
    return %arg1, %c0_i32 : i32, i32
  }
  func.func @transform_3(%arg0: i32, %arg1: i32) -> (i32, i32) {
    %c0_i32 = arith.constant 0 : i32
    %c0_i32_0 = arith.constant 0 : i32
    return %arg1, %c0_i32 : i32, i32
  }
  func.func @transform_4(%arg0: i32, %arg1: i32) -> (i32, i32) {
    %c0_i32 = arith.constant 0 : i32
    %c0_i32_0 = arith.constant 0 : i32
    %c0_i32_1 = arith.constant 0 : i32
    return %c0_i32, %c0_i32_0 : i32, i32
  }
  func.func @transform_5(%arg0: i32, %arg1: i32) -> (i32, i32) {
    %c0_i32 = arith.constant 0 : i32
    %c0_i32_0 = arith.constant 0 : i32
    %c0_i32_1 = arith.constant 0 : i32
    return %c0_i32, %c0_i32_0 : i32, i32
  }
  func.func @transform_6(%arg0: i32, %arg1: i32) -> (i32, i32) {
    %c0_i32 = arith.constant 0 : i32
    %c0_i32_0 = arith.constant 0 : i32
    %c0_i32_1 = arith.constant 0 : i32
    return %c0_i32, %c0_i32_0 : i32, i32
  }
  func.func @transform_7(%arg0: i32, %arg1: i32) -> (i32, i32) {
    %c0_i32 = arith.constant 0 : i32
    %c0_i32_0 = arith.constant 0 : i32
    %c0_i32_1 = arith.constant 0 : i32
    return %c0_i32, %c0_i32_0 : i32, i32
  }
  func.func @transform_8(%arg0: i32, %arg1: i32) -> (i32, i32) {
    %c0_i32 = arith.constant 0 : i32
    %c0_i32_0 = arith.constant 0 : i32
    %c0_i32_1 = arith.constant 0 : i32
    return %c0_i32, %c0_i32_0 : i32, i32
  }
  func.func @transform_9(%arg0: i32, %arg1: i32) -> (i32, i32) {
    %c0_i32 = arith.constant 0 : i32
    %c0_i32_0 = arith.constant 0 : i32
    %c0_i32_1 = arith.constant 0 : i32
    return %c0_i32, %c0_i32_0 : i32, i32
  }
  func.func @transform_10(%arg0: i32, %arg1: i32) -> (i32, i32) {
    %c0_i32 = arith.constant 0 : i32
    %c0_i32_0 = arith.constant 0 : i32
    %c0_i32_1 = arith.constant 0 : i32
    return %c0_i32, %c0_i32_0 : i32, i32
  }
  func.func @transform_11(%arg0: i32, %arg1: i32) -> (i32, i32) {
    %c0_i32 = arith.constant 0 : i32
    %c0_i32_0 = arith.constant 0 : i32
    %c0_i32_1 = arith.constant 0 : i32
    return %c0_i32, %c0_i32_0 : i32, i32
  }
  func.func @transform_12(%arg0: i32, %arg1: i32) -> (i32, i32) {
    %c0_i32 = arith.constant 0 : i32
    %c0_i32_0 = arith.constant 0 : i32
    %c0_i32_1 = arith.constant 0 : i32
    return %c0_i32, %c0_i32_0 : i32, i32
  }
  func.func @transform_13(%arg0: i32, %arg1: i32) -> (i32, i32) {
    %c0_i32 = arith.constant 0 : i32
    %c0_i32_0 = arith.constant 0 : i32
    %c0_i32_1 = arith.constant 0 : i32
    return %c0_i32, %c0_i32_0 : i32, i32
  }
  func.func @transform_14(%arg0: i32, %arg1: i32) -> (i32, i32) {
    %c0_i32 = arith.constant 0 : i32
    %c0_i32_0 = arith.constant 0 : i32
    return %arg0, %c0_i32 : i32, i32
  }
}

</mosaic_0001>

<bundles_post_ra>
// kernel: tpu_custom_call.1
= control target key start
LH: loop header
LB: loop body
LE: loop exit
PB: predicated region body
PF: predicated region fallthrough
CT: control target
= control target key end

     0   :  { %s3370_s0 = inlined_call_operand.vmem [shape: f32[16,16], index: 0, kind: input, shape index: {}]   ;;  %s3371_s1 = inlined_call_operand.vmem [shape: f32[16,16], index: 1, kind: input, shape index: {}]   ;;  %s3372_s2 = inlined_call_operand.vmem [shape: f32[16,16], index: 2, kind: input, shape index: {}]   ;;  %s3373_s3 = inlined_call_operand.vmem [shape: f32[16,16], index: 3, kind: input, shape index: {}]   ;;  %s3374_s4 = inlined_call_operand.vmem [shape: f32[16,64], index: 4, kind: input, shape index: {}]   ;;  %s3375_s5 = inlined_call_operand.vmem [shape: f32[1,64], index: 5, kind: input, shape index: {}]   ;;  %s3376_s6 = inlined_call_operand.vmem [shape: bf16[64,16], index: 6, kind: input, shape index: {}]   ;;  %s3377_s7 = inlined_call_operand.vmem [shape: f32[1,16], index: 7, kind: input, shape index: {}]   ;;  %s3378_s8 = inlined_call_operand.vmem [shape: bf16[16,64], index: 8, kind: input, shape index: {}]   ;;  %s3379_s9 = inlined_call_operand.vmem [shape: f32[1,64], index: 9, kind: input, shape index: {}]   ;;  %s3380_s10 = inlined_call_operand.vmem [shape: f32[64,16], index: 10, kind: input, shape index: {}]   ;;  %s3381_s11 = inlined_call_operand.vmem [shape: f32[1,16], index: 11, kind: input, shape index: {}]   ;;  %s3382_s12 = inlined_call_operand.vmem [shape: f32[16,16], index: 12, kind: input, shape index: {}]   ;;  %s3383_s13 = inlined_call_operand.vmem [shape: f32[1,16], index: 13, kind: input, shape index: {}]   ;;  %s3384_s14 = inlined_call_operand.hbm [shape: f32[16,16], index: 14, kind: output, shape index: {}]  }
   0x1   :  { %3396 = sst [smem:[#allocation12_spill]] %s3370_s0 }
   0x2   :  { %3397 = sst [smem:[#allocation13_spill]] %s3371_s1 }
   0x3   :  { %19 = vsyncpa [#allocation6], 0 }
   0x4   :  { %21 = vsyncpa [#allocation6 + $0x1], 0  ;;  %s2692_s29 = smov 0   ;;  %s2694_s30 = smov 0  }
   0x5   :  { %s2696_s15 = smov 0   ;;  %s2698_s16 = smov 0  }
   0x6   :  { %s2700_s17 = smov 0   ;;  %s2702_s18 = smov 0  }
   0x7 LB: > { %3398 = sst [smem:[#allocation8_spill]] %s2590_s29  ;;  %s2235_s19 = sadd.s32 4294967295, %s2610_s18   ;;  %s2610_s18 = sphi %s2702_s18, %s27_s18   ;;  %s2606_s17 = sphi %s2700_s17, %s3417_s17   ;;  %s2602_s16 = sphi %s2698_s16, %s3416_s16   ;;  %s2598_s15 = sphi %s2696_s15, %s3420_s15   ;;  %s2594_s30 = sphi %s2694_s30, %s3419_s30   ;;  %s2590_s29 = sphi %s2692_s29, %s3418_s29  }
   0x8   : > { %3399 = sst [smem:[#allocation9_spill]] %s2606_s17  ;;  %s2236_s20 = sadd.s32 4294967294, %s2610_s18  }
   0x9   : > { %s39_s21 = sadd.s32 1, %s2606_s17  ;;  %s362_s22 = sadd.s32 1, %s2598_s15 }
   0xa   : > { %p41_p0 = scmp.ge.s32.totalorder %s39_s21, 2  ;;  %p372_p1 = scmp.ne.s32.totalorder %s2598_s15, %s2594_s30 }
   0xb   : > { %p373_p2 = scmp.eq.s32.totalorder %s2235_s19, 1  ;;  %p378_p3 = scmp.ne.s32.totalorder %s2594_s30, %s2590_s29 }
   0xc   : > { %s3422_s21 = smov (%p41_p0, %s39_s21), 0  ;;  %p379_p5 = scmp.eq.s32.totalorder %s2236_s20, 1 }
   0xd   : > { %3400 = sst [smem:[#allocation10_spill]] %s3422_s21  ;;  %p2732_p4 = por %p373_p2, %p372_p1 }
   0xe   : > { %s359_s24 = ssub.s32 %s2606_s17, %s3422_s21  ;;  %p2241_p6 = scmp.ge.s32.totalorder %s2610_s18, 1 }
   0xf   : > { %p360_p7 = scmp.eq.s32.totalorder %s359_s24, 0  ;;  %p2739_p8 = por %p379_p5, %p378_p3 }
  0x10   : > { %p462_p9 = scmp.lt.s32.totalorder %s2610_s18, 3 }
  0x11   : > { %s2745_s26 = scalar_select %p360_p7, %s2598_s15, %s362_s22  }
  0x12   : > { %p463_p10 = pnand %p2241_p6, %p462_p9 }
  0x13   : > { %3403 = sst [smem:[#allocation11_spill]] %s2745_s26  ;;  %s2245_s19 = sshll.u32 (!%p463_p10), %s2602_s16, 3 }
  0x14   : > { %466 = sbr.rel (%p463_p10) target bundleno = 1009 (0x3f1), region = 76  ;;  %s558_s22 = scalar_lea.vmem (!%p463_p10), %s3374_s4, %s2245_s19 }
  0x15   : > { %p524_p11 = scmp.lt.s32.totalorder (!%p463_p10), %s2602_s16, 1  ;;  %s3404_s1 = sld [smem:[#allocation13_spill]] (!%p463_p10) }
  0x16   : > { %s3405_s0 = sld [smem:[#allocation12_spill]] (!%p463_p10)  ;;  %s2290_s27 = sshll.u32 (!%p463_p10), %s2602_s16, 7 }
  0x17   : > { %s2616_s24 = smov (!%p463_p10), [#allocation5]  }
  0x19   : > { %v2491_v0 = vld [vmem:[%s3376_s6 + $0x18] sm:$0xff]   ;;  %v2492_v1 = vld [vmem:[%s3376_s6 + $0x10] sm:$0xff]   ;;  %v568_v2 = vlaneseq  ;;  %v2493_v3 = vld [vmem:[%s3376_s6 + $0x8] sm:$0xff]   ;;  %v2612_v4 = vmov 1966171168   ;;  %vm755_vm0 = vcmask 523264  }
  0x1a   : > { %2341 = vmatprep.subr.bf16.mxu0 %v2491_v0  ;;  %v566_v5 = vunpack.c.l.s4 %v2612_v4  ;;  %v559_v7 = vld [vmem:[%s558_s22] sm:$0xff]  ;;  %v2790_v21 = vld [vmem:[%s3374_s4 + $0x8] sm:$0xff]  ;;  %s2857_s21 = scalar_select %p524_p11, %s2602_s16, 1  ;;  %vm552_vm1 = vcmask 130048   ;;  %vm2615_vm2 = vmmov 0   ;;  %vm1637_vm3 = vcmask 1041409  }
  0x1b   : > { %2342 = vmatpush3.bf16.msra.mxu0 %v2491_v0  ;;  %v2760_v6 = vshrl.u32 %v568_v2, 7  ;;  %v2765_v8 = vld [vmem:[%s3378_s8] sm:$0xff]   ;;  %v564_v9 = vcombine.high %v559_v7, %v559_v7  ;;  %vm1639_vm4 = vcmask 1042434   ;;  %vm1641_vm5 = vcmask 1043459   ;;  %s2538_s16 = sshll.u32 %s2616_s24, 4  ;;  %s2539_s16 = int_to_ptr.vmem [resolvable:$false] %s2538_s16 }
  0x1c   : > { %2343 = vmatprep.subr.bf16.mxu0 %v2492_v1  ;;  %v567_v10 = vunpack.c.0.s8 %v566_v5  ;;  %v2494_v11 = vld [vmem:[%s3376_s6] sm:$0xff]   ;;  %2430 = vmatprep.subr.bf16.mxu1 %v2765_v8  ;;  %s2243_s28 = sshll.u32 %s2857_s21, 3  ;;  %vm1643_vm6 = vcmask 1044484   ;;  %vm1645_vm7 = vcmask 1045509   ;;  %vm1647_vm8 = vcmask 1046534  }
  0x1d   : > { %2431 = vmatpush3.bf16.msra.mxu1 %v2765_v8  ;;  %v2778_v15 = vsub.s32 0, %v2760_v6  ;;  %v2785_v20 = vld [vmem:[%s3374_s4] sm:$0xff]  ;;  %s534_s19 = scalar_lea.vmem %s3404_s1, %s2243_s28  ;;  %s530_s26 = scalar_lea.vmem %s3405_s0, %s2243_s28  ;;  %vm1649_vm9 = vcmask 1047559  }
  0x1e   : > { %v2772_v12 = vsub.s32 %v567_v10, %v2760_v6  ;;  %v2798_v26 = vld [vmem:[%s3375_s5] ss:$0 sm:$0xff]  ;;  %s2117_s28 = scalar_lea.hbm %s3384_s14, %s2290_s27 }
  0x1f   : > { %2344 = vmatpush3.bf16.msra.mxu0 %v2492_v1 }
  0x20   : > { %2345 = vmatprep.subr.bf16.mxu0 %v2493_v3  ;;  %v571_v13 = vrot.slane %v559_v7, %v2772_v12  ;;  %v578_v14 = vrot.slane %v564_v9, %v2772_v12 }
  0x22   : > { %v579_v16 = vcombine.high %v571_v13, %v571_v13  ;;  %v587_v17 = vrot.slane %v571_v13, %v2772_v12  ;;  %v594_v18 = vrot.slane %v578_v14, %v2772_v12  ;;  %v580_v19 = vcombine.high %v578_v14, %v578_v14 }
  0x23   : > { %2346 = vmatpush3.bf16.msra.mxu0 %v2493_v3 }
  0x24   : > { %2347 = vmatprep.subr.bf16.mxu0 %v2494_v11  ;;  %v609_v22 = vcombine.high %v587_v17, %v587_v17  ;;  %v616_v23 = vrot.slane %v587_v17, %v2778_v15  ;;  %v601_v24 = vrot.slane %v579_v16, %v2772_v12  ;;  %v632_v25 = vrot.slane %v594_v18, %v2778_v15 }
  0x25   : > { %v608_v27 = vrot.slane %v580_v19, %v2772_v12  ;;  %v610_v28 = vcombine.high %v594_v18, %v594_v18 }
  0x26   : > { %v653_v29 = vsub.f32 %v616_v23, %v2785_v20  ;;  %v654_v30 = vsub.f32 %v616_v23, %v2790_v21  ;;  %v620_v31 = vrot.slane %v601_v24, %v2778_v15  ;;  %v624_v32 = vrot.slane %v609_v22, %v2778_v15 }
  0x27   : > { %2348 = vmatpush3.bf16.msra.mxu0 %v2494_v11  ;;  %v611_v33 = vcombine.high %v601_v24, %v601_v24  ;;  %v661_v34 = vsub.f32 %v632_v25, %v2785_v20  ;;  %v662_v35 = vsub.f32 %v632_v25, %v2790_v21  ;;  %v636_v36 = vrot.slane %v608_v27, %v2778_v15 }
  0x28   : > { %2365 = vmatprep.subr.bf16.mxu0 %v2765_v8  ;;  %v676_v37 = vadd.f32 %v2798_v26, %v653_v29  ;;  %v677_v38 = vadd.f32 %v2798_v26, %v654_v30  ;;  %v655_v39 = vsub.f32 %v620_v31, %v2785_v20  ;;  %v656_v40 = vsub.f32 %v620_v31, %v2790_v21 }
  0x29   : > { %v657_v41 = vsub.f32 %v624_v32, %v2785_v20  ;;  %v658_v42 = vsub.f32 %v624_v32, %v2790_v21  ;;  %v628_v43 = vrot.slane %v611_v33, %v2778_v15  ;;  %v684_v44 = vadd.f32 %v2798_v26, %v661_v34 }
  0x2a   : > { %v692_v45 = vmax.f32 %v676_v37, 0.0  ;;  %v693_v46 = vmax.f32 %v677_v38, 0.0  ;;  %v678_v47 = vadd.f32 %v2798_v26, %v655_v39  ;;  %v679_v48 = vadd.f32 %v2798_v26, %v656_v40  ;;  %v2869_v37 = vld [vmem:[%s3377_s7] ss:$0 sm:$0xff] }
  0x2b   : > { %v680_v49 = vadd.f32 %v2798_v26, %v657_v41  ;;  %v681_v50 = vadd.f32 %v2798_v26, %v658_v42  ;;  %v659_v51 = vsub.f32 %v628_v43, %v2785_v20  ;;  %v660_v52 = vsub.f32 %v628_v43, %v2790_v21 }
  0x2c   : > { %v708_v53 = vpack.c.bf16 %v693_v46, %v692_v45  ;;  %v694_v54 = vmax.f32 %v678_v47, 0.0  ;;  %v695_v55 = vmax.f32 %v679_v48, 0.0  ;;  %v685_v56 = vadd.f32 %v2798_v26, %v662_v35 }
  0x2d   : > { %v696_v57 = vmax.f32 %v680_v49, 0.0  ;;  %v697_v58 = vmax.f32 %v681_v50, 0.0  ;;  %v682_v59 = vadd.f32 %v2798_v26, %v659_v51  ;;  %v683_v60 = vadd.f32 %v2798_v26, %v660_v52  ;;  %v2880_v50 = vld [vmem:[%s3372_s2] sm:$0xff]  ;;  %v2886_v52 = vld [vmem:[%s3372_s2 + $0x8] sm:$0xff] }
  0x2e   : > { %2349 = vmatprep.mubr.msk.bf16.mxu0 %vm755_vm0, %v708_v53  ;;  %v709_v61 = vpack.c.bf16 %v695_v55, %v694_v54  ;;  %v663_v0 = vsub.f32 %v636_v36, %v2785_v20  ;;  %v664_v2 = vsub.f32 %v636_v36, %v2790_v21  ;;  %v640_v3 = vrot.slane %v610_v28, %v2778_v15 }
  0x2f   : > { %v710_v62 = vpack.c.bf16 %v697_v58, %v696_v57  ;;  %v698_v63 = vmax.f32 %v682_v59, 0.0  ;;  %v699_v1 = vmax.f32 %v683_v60, 0.0  ;;  %v612_v4 = vcombine.high %v608_v27, %v608_v27 }
  0x30   : > { %2350 = vmatmul.mubr.msk.bf16.vlgmr.msra.gmra.mxu0 %vm755_vm0, %v709_v61  ;;  %v700_v5 = vmax.f32 %v684_v44, 0.0  ;;  %v701_v7 = vmax.f32 %v685_v56, 0.0  ;;  %v665_v9 = vsub.f32 %v640_v3, %v2785_v20  ;;  %v666_v10 = vsub.f32 %v640_v3, %v2790_v21 }
  0x31   : > { %2353 = vmatprep.mubr.msk.bf16.mxu0 %vm755_vm0, %v710_v62  ;;  %2366 = vmatpush3.bf16.msra.mxu0 %v2765_v8  ;;  %v711_v11 = vpack.c.bf16 %v699_v1, %v698_v63  ;;  %v686_v13 = vadd.f32 %v2798_v26, %v663_v0  ;;  %v687_v14 = vadd.f32 %v2798_v26, %v664_v2 }
  0x32   : > { %v644_v16 = vrot.slane %v612_v4, %v2778_v15  ;;  %v712_v17 = vpack.c.bf16 %v701_v7, %v700_v5  ;;  %v688_v18 = vadd.f32 %v2798_v26, %v665_v9  ;;  %v689_v19 = vadd.f32 %v2798_v26, %v666_v10 }
  0x33   : > { %v702_v22 = vmax.f32 %v686_v13, 0.0  ;;  %v703_v8 = vmax.f32 %v687_v14, 0.0 }
  0x34   : > { %v667_v23 = vsub.f32 %v644_v16, %v2785_v20  ;;  %v668_v24 = vsub.f32 %v644_v16, %v2790_v21  ;;  %v704_v25 = vmax.f32 %v688_v18, 0.0  ;;  %v705_v27 = vmax.f32 %v689_v19, 0.0  ;;  %v2852_v21 = vld [vmem:[%s3380_s10 + $0x38] sm:$0xff] }
  0x35   : > { %v713_v28 = vpack.c.bf16 %v703_v8, %v702_v22  ;;  %2383 = vmatprep.subr.mxu1 %v2852_v21 }
  0x36   : > { %v690_v29 = vadd.f32 %v2798_v26, %v667_v23  ;;  %v691_v30 = vadd.f32 %v2798_v26, %v668_v24  ;;  %v714_v31 = vpack.c.bf16 %v705_v27, %v704_v25  ;;  %v901_v26 = vld [vmem:[%s534_s19] sm:$0xff]  ;;  %s521_s19 = sand.u32 1, %s2594_s30  }
  0x37   : > { %v910_v34 = vrot.slane %v901_v26, %v2772_v12  ;;  %v903_v47 = vcombine.high %v901_v26, %v901_v26  ;;  %s2242_s20 = sshll.u32 %s521_s19, 3  ;;  %s2106_s0 = scalar_lea.sflag [#allocation6], %s521_s19 }
  0x38   : > { %2354 = vmatmul.mubr.msk.bf16.gmra.mxu0 %vm755_vm0, %v711_v11  ;;  %v706_v32 = vmax.f32 %v690_v29, 0.0  ;;  %v707_v33 = vmax.f32 %v691_v30, 0.0  ;;  %s523_s29 = scalar_lea.vmem [#allocation5], %s2242_s20  ;;  %s2540_s20 = scalar_lea.vmem %s2539_s16, 256 }
  0x39   : > { %2357 = vmatprep.mubr.msk.bf16.mxu0 %vm755_vm0, %v712_v17  ;;  %v918_v35 = vcombine.high %v910_v34, %v910_v34  ;;  %v926_v42 = vrot.slane %v910_v34, %v2772_v12  ;;  %v917_v61 = vrot.slane %v903_v47, %v2772_v12  ;;  %s2119_s17 = sshll.u32 %s523_s29, 4  ;;  %s2120_s17 = int_to_ptr.vmem [resolvable:$true] %s2119_s17 }
  0x3a   : > { %v715_v20 = vpack.c.bf16 %v707_v33, %v706_v32  ;;  %s2534_s1 = scalar_lea.vmem %s2120_s17, 128  ;;  %p2541_p1 = scmp.lt.s32.totalorder %s2120_s17, %s2539_s16 }
  0x3b   : > { %v940_v39 = vrot.slane %v918_v35, %v2772_v12  ;;  %v957_v53 = vrot.slane %v926_v42, %v2778_v15  ;;  %v948_v5 = vcombine.high %v926_v42, %v926_v42  ;;  %v919_v17 = vcombine.high %v917_v61, %v917_v61  ;;  %p2535_p12 = scmp.ne.s32.totalorder %s2120_s17, %s2534_s1  ;;  %p2542_p2 = scmp.lt.s32.totalorder %s2540_s20, %s2534_s1 }
  0x3d   : > { %v961_v45 = vrot.slane %v940_v39, %v2778_v15  ;;  %v950_v58 = vcombine.high %v940_v39, %v940_v39  ;;  %v994_v2 = vsub.f32 %v957_v53, %v2880_v50  ;;  %v995_v3 = vsub.f32 %v957_v53, %v2886_v52  ;;  %p2536_p13 = pnand %p2535_p12, %p2732_p4  ;;  %p2543_p3 = por %p2542_p2, %p2541_p1 }
  0x3e   : > { %v965_v25 = vrot.slane %v948_v5, %v2778_v15 }
  0x3f   : > { %v996_v59 = vsub.f32 %v961_v45, %v2880_v50  ;;  %v997_v62 = vsub.f32 %v961_v45, %v2886_v52  ;;  %v969_v10 = vrot.slane %v950_v58, %v2778_v15  ;;  %p2537_p0 = pneg %p2536_p13 }
  0x40   : > { %2358 = vmatmul.mubr.msk.bf16.gmra.mxu0 %vm755_vm0, %v713_v28  ;;  %v999_v42 = vsub.f32 %v965_v25, %v2886_v52 }
  0x41   : > { %2361 = vmatprep.mubr.msk.bf16.mxu0 %vm755_vm0, %v714_v31  ;;  %v1000_v31 = vsub.f32 %v969_v10, %v2880_v50  ;;  %p2544_p5 = pnand %p2543_p3, %p2537_p0 }
  0x48   : > { %2362 = vmatmul.mubr.msk.bf16.gmra.mxu0 %vm755_vm0, %v715_v20  ;;  %v947_v20 = vrot.slane %v919_v17, %v2772_v12 }
  0x4a   : > { %v977_v53 = vrot.slane %v947_v20, %v2778_v15 }
  0xf0   : > { %v2351_v36 = vpop.f32.mrf.mxu0 }
  0xf1   : > { %v823_v40 = vadd.f32 %v2351_v36, %v2869_v37 }
  0xf2   : > { %v814_v38 = vpop.f32.mrf.mxu0 }
  0xf3   : > { %v815_v43 = vadd.f32 %v2869_v37, %v814_v38  ;;  %v879_v48 = vmax.f32 %v823_v40, 0.0  ;;  %v1001_v38 = vsub.f32 %v969_v10, %v2886_v52  ;;  %v933_v40 = vrot.slane %v917_v61, %v2772_v12 }
  0xf4   : > { %v2352_v41 = vpop.f32.mrf.mxu0  ;;  %v1005_v10 = vsub.f32 %v977_v53, %v2886_v52 }
  0xf5   : > { %v826_v44 = vadd.f32 %v2352_v41, %v2869_v37  ;;  %v877_v55 = vmax.f32 %v815_v43, 0.0  ;;  %v998_v41 = vsub.f32 %v965_v25, %v2880_v50 }
  0xf6   : > { %v817_v46 = vpop.f32.mrf.mxu0 }
  0xf7   : > { %v880_v49 = vmax.f32 %v826_v44, 0.0  ;;  %v818_v51 = vadd.f32 %v2869_v37, %v817_v46 }
  0xf8   : > { %v2355_v54 = vpop.f32.mrf.mxu0 }
  0xf9   : > { %v2889_v56 = vpack.c.bf16 %v880_v49, %v879_v48  ;;  %v878_v57 = vmax.f32 %v818_v51, 0.0  ;;  %v839_v7 = vadd.f32 %v2355_v54, %v2869_v37 }
  0xfa   : > { %v830_v60 = vpop.f32.mrf.mxu0 }
  0xfb   : > { %v1012_v63 = vunpack.c.l.bf16 %v2889_v56  ;;  %v1013_v0 = vunpack.c.h.bf16 %v2889_v56  ;;  %v2896_v1 = vpack.c.bf16 %v878_v57, %v877_v55  ;;  %v831_v9 = vadd.f32 %v2869_v37, %v830_v60 }
  0xfc   : > { %v2356_v4 = vpop.f32.mrf.mxu0  ;;  %v883_v27 = vmax.f32 %v839_v7, 0.0  ;;  %v973_v60 = vrot.slane %v933_v40, %v2778_v15  ;;  %v951_v7 = vcombine.high %v947_v20, %v947_v20 }
  0xfd   : > { %v1010_v11 = vunpack.c.l.bf16 %v2896_v1  ;;  %v1011_v13 = vunpack.c.h.bf16 %v2896_v1  ;;  %v842_v14 = vadd.f32 %v2356_v4, %v2869_v37  ;;  %v1028_v18 = vadd.f32 %v1012_v63, %v996_v59 }
  0xfe   : > { %v833_v16 = vpop.f32.mrf.mxu0  ;;  %v1029_v19 = vadd.f32 %v1013_v0, %v997_v62  ;;  %v881_v28 = vmax.f32 %v831_v9, 0.0  ;;  %v1004_v9 = vsub.f32 %v977_v53, %v2880_v50 }
  0xff   : > { %v834_v22 = vadd.f32 %v2869_v37, %v833_v16  ;;  %v1026_v8 = vadd.f32 %v1010_v11, %v994_v2  ;;  %v1027_v23 = vadd.f32 %v1011_v13, %v995_v3  ;;  %v884_v29 = vmax.f32 %v842_v14, 0.0 }
 0x100   : > { %v2359_v24 = vpop.f32.mrf.mxu0  ;;  %v1043_v26 = vpack.c.bf16 %v1029_v19, %v1028_v18 }
 0x101   : > { %v882_v30 = vmax.f32 %v834_v22, 0.0  ;;  %v1042_v33 = vpack.c.bf16 %v1027_v23, %v1026_v8  ;;  %v2918_v34 = vpack.c.bf16 %v884_v29, %v883_v27  ;;  %v855_v36 = vadd.f32 %v2359_v24, %v2869_v37 }
 0x102   : > { %v846_v32 = vpop.f32.mrf.mxu0  ;;  %v1002_v23 = vsub.f32 %v973_v60, %v2880_v50  ;;  %v1003_v24 = vsub.f32 %v973_v60, %v2886_v52  ;;  %v949_v27 = vcombine.high %v933_v40, %v933_v40  ;;  %v1230_v60 = vld [vmem:[%s3380_s10 + $0x18] sm:$0xff] }
 0x103   : > { %v2920_v35 = vpack.c.bf16 %v882_v30, %v881_v28  ;;  %2367 = vmatprep.mubr.msk.bf16.mxu0 %vm552_vm1, %v1042_v33  ;;  %v1016_v43 = vunpack.c.l.bf16 %v2918_v34  ;;  %v1017_v44 = vunpack.c.h.bf16 %v2918_v34  ;;  %v847_v47 = vadd.f32 %v2869_v37, %v846_v32  ;;  %v1233_v28 = vld [vmem:[%s3380_s10 + $0x30] sm:$0xff] }
 0x104   : > { %v2360_v39 = vpop.f32.mrf.mxu0  ;;  %2368 = vmatmul.mubr.msk.bf16.vlgmr.msra.gmra.mxu0 %vm552_vm1, %v1043_v26  ;;  %v887_v51 = vmax.f32 %v855_v36, 0.0  ;;  %v985_v30 = vrot.slane %v951_v7, %v2778_v15  ;;  %v1232_v36 = vld [vmem:[%s3380_s10 + $0x28] sm:$0xff] }
 0x105   : > { %v1014_v45 = vunpack.c.l.bf16 %v2920_v35  ;;  %v1015_v46 = vunpack.c.h.bf16 %v2920_v35  ;;  %v858_v48 = vadd.f32 %v2360_v39, %v2869_v37  ;;  %v1032_v54 = vadd.f32 %v1016_v43, %v1000_v31 }
 0x106   : > { %v849_v49 = vpop.f32.mrf.mxu0  ;;  %v1033_v55 = vadd.f32 %v1017_v44, %v1001_v38  ;;  %v885_v2 = vmax.f32 %v847_v47, 0.0  ;;  %v1009_v53 = vsub.f32 %v985_v30, %v2886_v52 }
 0x107   : > { %v888_v57 = vmax.f32 %v858_v48, 0.0  ;;  %v850_v58 = vadd.f32 %v2869_v37, %v849_v49  ;;  %v1030_v61 = vadd.f32 %v1014_v45, %v998_v41  ;;  %v1031_v62 = vadd.f32 %v1015_v46, %v999_v42  ;;  %v1231_v42 = vld [vmem:[%s3380_s10 + $0x20] sm:$0xff] }
 0x108   : > { %v2363_v59 = vpop.f32.mrf.mxu0  ;;  %v1045_v8 = vpack.c.bf16 %v1033_v55, %v1032_v54 }
 0x109   : > { %v2946_v3 = vpack.c.bf16 %v888_v57, %v887_v51  ;;  %v886_v4 = vmax.f32 %v850_v58, 0.0  ;;  %v871_v14 = vadd.f32 %v2363_v59, %v2869_v37  ;;  %v1044_v16 = vpack.c.bf16 %v1031_v62, %v1030_v61 }
 0x10a   : > { %v862_v5 = vpop.f32.mrf.mxu0  ;;  %v1008_v51 = vsub.f32 %v985_v30, %v2880_v50 }
 0x10b   : > { %v3395_v17 = vunpack.c.l.bf16 %v2946_v3  ;;  %v3394_v18 = vunpack.c.h.bf16 %v2946_v3  ;;  %v2953_v19 = vpack.c.bf16 %v886_v4, %v885_v2  ;;  %2371 = vmatprep.mubr.msk.bf16.mxu1 %vm552_vm1, %v1044_v16  ;;  %v863_v29 = vadd.f32 %v2869_v37, %v862_v5  ;;  %v1228_v16 = vld [vmem:[%s3380_s10 + $0x8] sm:$0xff] }
 0x10c   : > { %v2364_v22 = vpop.f32.mrf.mxu0  ;;  %2372 = vmatmul.mubr.msk.bf16.vlgmr.msra.gmra.mxu1 %vm552_vm1, %v1045_v8  ;;  %v891_v40 = vmax.f32 %v871_v14, 0.0  ;;  %v1229_v14 = vld [vmem:[%s3380_s10 + $0x10] sm:$0xff]  ;;  %v1465_v8 = vsub.s32 1, %v2760_v6 }
 0x10d   : > { %v874_v25 = vadd.f32 %v2364_v22, %v2869_v37  ;;  %v3393_v32 = vunpack.c.l.bf16 %v2953_v19  ;;  %v3392_v33 = vunpack.c.h.bf16 %v2953_v19  ;;  %2384 = vmatpush3.msra.mxu1 %v2852_v21  ;;  %v1036_v38 = vadd.f32 %v3395_v17, %v1004_v9  ;;  %v1227_v22 = vld [vmem:[%s3380_s10] sm:$0xff] }
 0x10e   : > { %v865_v31 = vpop.f32.mrf.mxu0  ;;  %v1037_v39 = vadd.f32 %v3394_v18, %v1005_v10  ;;  %2385 = vmatprep.subr.mxu1 %v1233_v28  ;;  %v981_v21 = vrot.slane %v949_v27, %v2778_v15  ;;  %v889_v47 = vmax.f32 %v863_v29, 0.0  ;;  %v1476_v27 = vsub.s32 2, %v2760_v6 }
 0x10f   : > { %v892_v20 = vmax.f32 %v874_v25, 0.0  ;;  %v866_v26 = vadd.f32 %v2869_v37, %v865_v31  ;;  %v1034_v41 = vadd.f32 %v3393_v32, %v1002_v23  ;;  %v1035_v37 = vadd.f32 %v3392_v33, %v1003_v24  ;;  %2386 = vmatpush3.msra.mxu1 %v1233_v28  ;;  %v1451_v23 = vld [vmem:[%s530_s26] sm:$0xff] }
 0x110   : > { %2387 = vmatprep.subr.mxu1 %v1232_v36  ;;  %v1047_v59 = vpack.c.bf16 %v1037_v39, %v1036_v38  ;;  %v1006_v61 = vsub.f32 %v981_v21, %v2880_v50  ;;  %v1007_v62 = vsub.f32 %v981_v21, %v2886_v52  ;;  %v1455_v24 = vrot.slane %v1451_v23, %v2778_v15  ;;  %v2260_v21 = vld [vmem:[%s3379_s9] ss:$0 sm:$0xff] }
 0x111   : > { %v2984_v48 = vpack.c.bf16 %v892_v20, %v891_v40  ;;  %v890_v49 = vmax.f32 %v866_v26, 0.0  ;;  %v1046_v54 = vpack.c.bf16 %v1035_v37, %v1034_v41  ;;  %2388 = vmatpush3.msra.mxu1 %v1232_v36  ;;  %v1466_v25 = vrot.slane %v1451_v23, %v1465_v8 }
 0x112   : > { %2389 = vmatprep.subr.mxu1 %v1231_v42  ;;  %1457 = vbcast.lane.b32.xlu0 %v1455_v24, 256  ;;  %v1477_v28 = vrot.slane %v1451_v23, %v1476_v27  ;;  %v1487_v29 = vsub.s32 3, %v2760_v6  ;;  %v1498_v31 = vsub.s32 4, %v2760_v6  ;;  %v1509_v26 = vsub.s32 5, %v2760_v6 }
 0x113   : > { %v3391_v55 = vunpack.c.l.bf16 %v2984_v48  ;;  %v3390_v57 = vunpack.c.h.bf16 %v2984_v48  ;;  %v2990_v58 = vpack.c.bf16 %v890_v49, %v889_v47  ;;  %2375 = vmatprep.mubr.msk.bf16.mxu1 %vm552_vm1, %v1046_v54  ;;  %2390 = vmatpush3.msra.mxu1 %v1231_v42  ;;  %v1520_v38 = vsub.s32 6, %v2760_v6 }
 0x114   : > { %2376 = vmatmul.mubr.msk.bf16.gmra.mxu1 %vm552_vm1, %v1047_v59  ;;  %2391 = vmatprep.subr.mxu1 %v1230_v60  ;;  %v1488_v30 = vrot.slane %v1451_v23, %v1487_v29  ;;  %v1499_v20 = vrot.slane %v1451_v23, %v1498_v31  ;;  %v1510_v36 = vrot.slane %v1451_v23, %v1509_v26  ;;  %v1531_v40 = vsub.s32 7, %v2760_v6 }
 0x115   : > { %v3389_v2 = vunpack.c.l.bf16 %v2990_v58  ;;  %v3388_v4 = vunpack.c.h.bf16 %v2990_v58  ;;  %v1040_v5 = vadd.f32 %v3391_v55, %v1008_v51  ;;  %v1041_v7 = vadd.f32 %v3390_v57, %v1009_v53  ;;  %2392 = vmatpush3.msra.mxu1 %v1230_v60  ;;  %1468 = vbcast.lane.b32.xlu1 %v1466_v25, 256 }
 0x116   : > { %2393 = vmatprep.subr.mxu1 %v1229_v14  ;;  %1461 = vbcast.lane.b32.xlu0 %v1455_v24, 264  ;;  %v1521_v39 = vrot.slane %v1451_v23, %v1520_v38  ;;  %v1532_v41 = vrot.slane %v1451_v23, %v1531_v40  ;;  %v3408_v34 = vunpack.c.l.bf16 %v2953_v19  ;;  %v3410_v35 = vunpack.c.l.bf16 %v2984_v48 }
 0x117   : > { %v1038_v50 = vadd.f32 %v3389_v2, %v1006_v61  ;;  %v1039_v52 = vadd.f32 %v3388_v4, %v1007_v62  ;;  %v1049_v10 = vpack.c.bf16 %v1041_v7, %v1040_v5  ;;  %2394 = vmatpush3.msra.mxu1 %v1229_v14 }
 0x118   : > { %2395 = vmatprep.subr.mxu1 %v1228_v16 }
 0x119   : > { %v1048_v9 = vpack.c.bf16 %v1039_v52, %v1038_v50  ;;  %2396 = vmatpush3.msra.mxu1 %v1228_v16  ;;  %1472 = vbcast.lane.b32.xlu1 %v1466_v25, 264 }
 0x11a   : > { %2397 = vmatprep.subr.mxu1 %v1227_v22  ;;  %1479 = vbcast.lane.b32.xlu0 %v1477_v28, 256 }
 0x11b   : > { %2379 = vmatprep.mubr.msk.bf16.mxu1 %vm552_vm1, %v1048_v9  ;;  %2398 = vmatpush3.msra.mxu1 %v1227_v22 }
 0x11c   : > { %2380 = vmatmul.mubr.msk.bf16.gmra.mxu1 %vm552_vm1, %v1049_v10 }
 0x11d   : > { %1483 = vbcast.lane.b32.xlu1 %v1477_v28, 264 }
 0x11e   : > { %1490 = vbcast.lane.b32.xlu0 %v1488_v30, 256 }
 0x121   : > { %1494 = vbcast.lane.b32.xlu1 %v1488_v30, 264 }
 0x122   : > { %1501 = vbcast.lane.b32.xlu0 %v1499_v20, 256 }
 0x125   : > { %1505 = vbcast.lane.b32.xlu1 %v1499_v20, 264 }
 0x126   : > { %1512 = vbcast.lane.b32.xlu0 %v1510_v36, 256 }
 0x129   : > { %1516 = vbcast.lane.b32.xlu1 %v1510_v36, 264 }
 0x12a   : > { %1523 = vbcast.lane.b32.xlu0 %v1521_v39, 256 }
 0x12d   : > { %1527 = vbcast.lane.b32.xlu1 %v1521_v39, 264 }
 0x12e   : > { %1534 = vbcast.lane.b32.xlu0 %v1532_v41, 256 }
 0x131   : > { %1538 = vbcast.lane.b32.xlu1 %v1532_v41, 264 }
 0x1c4   : > { %v2369_v37 = vpop.f32.mrf.mxu0 }
 0x1c5   : > { %v1133_v53 = vadd.f32 %v2369_v37, %v2260_v21 }
 0x1c6   : > { %v1124_v42 = vpop.f32.mrf.mxu0 }
 0x1c7   : > { %v1125_v47 = vadd.f32 %v2260_v21, %v1124_v42  ;;  %v1189_v62 = vmax.f32 %v1133_v53, 0.0 }
 0x1c8   : > { %v2370_v49 = vpop.f32.mrf.mxu0 }
 0x1c9   : > { %v1187_v51 = vmax.f32 %v1125_v47, 0.0  ;;  %v1136_v6 = vadd.f32 %v2370_v49, %v2260_v21 }
 0x1ca   : > { %v1127_v54 = vpop.f32.mrf.mxu0 }
 0x1cb   : > { %v1128_v59 = vadd.f32 %v2260_v21, %v1127_v54  ;;  %2399 = vmatprep.mubr.msk.f32.mxu1 %vm755_vm0, %v1187_v51  ;;  %v1190_v50 = vmax.f32 %v1136_v6, 0.0 }
 0x1cc   : > { %v2373_v61 = vpop.f32.mrf.mxu1 }
 0x1cd   : > { %v1188_v60 = vmax.f32 %v1128_v59, 0.0  ;;  %v1149_v10 = vadd.f32 %v2373_v61, %v2260_v21 }
 0x1ce   : > { %v1140_v5 = vpop.f32.mrf.mxu1 }
 0x1cf   : > { %2400 = vmatmul.mubr.msk.f32.vlgmr.msra.gmra.mxu1 %vm755_vm0, %v1188_v60  ;;  %v1141_v7 = vadd.f32 %v2260_v21, %v1140_v5  ;;  %v1193_v24 = vmax.f32 %v1149_v10, 0.0  ;;  %v2614_v5 = vmov 0.0  }
 0x1d0   : > { %2402 = vmatprep.mubr.msk.f32.mxu1 %vm755_vm0, %v1189_v62  ;;  %v2374_v52 = vpop.f32.mrf.mxu1  ;;  %v2613_v62 = vmov -inf   ;;  %554 = vst.msk [vmem:[#allocation3] sm:$0xff] %vm552_vm1, %v2614_v5  ;;  %555 = vst.msk [vmem:[#allocation4] sm:$0xff] %vm552_vm1, %v2614_v5  ;;  %2423 = vmatprep.subr.mxu0 %v2614_v5 }
 0x1d1   : > { %v1191_v9 = vmax.f32 %v1141_v7, 0.0  ;;  %v1152_v8 = vadd.f32 %v2374_v52, %v2260_v21  ;;  %553 = vst.msk [vmem:[#allocation2] sm:$0xff] %vm552_vm1, %v2613_v62  ;;  %v1469_v7 = vpop.permute.xlu1 %1468  ;;  %2427 = vmatprep.mubr.msk.f32.mxu0 %vm2615_vm2, %v2614_v5 }
 0x1d2   : > { %v1143_v14 = vpop.f32.mrf.mxu1 }
 0x1d3   : > { %2403 = vmatmul.mubr.msk.f32.gmra.mxu1 %vm755_vm0, %v1190_v50  ;;  %v1144_v16 = vadd.f32 %v2260_v21, %v1143_v14  ;;  %v1194_v29 = vmax.f32 %v1152_v8, 0.0  ;;  %v3058_v8 = vld [vmem:[%s3381_s11] ss:$0 sm:$0xff] }
 0x1d4   : > { %2405 = vmatprep.mubr.msk.f32.mxu1 %vm755_vm0, %v1191_v9  ;;  %v2377_v22 = vpop.f32.mrf.mxu1 }
 0x1d5   : > { %v1192_v23 = vmax.f32 %v1144_v16, 0.0  ;;  %v1165_v31 = vadd.f32 %v2377_v22, %v2260_v21  ;;  %v1473_v50 = vpop.permute.xlu1 %1472 }
 0x1d6   : > { %v1156_v25 = vpop.f32.mrf.mxu1 }
 0x1d7   : > { %v1157_v27 = vadd.f32 %v2260_v21, %v1156_v25  ;;  %2406 = vmatmul.mubr.msk.f32.gmra.mxu1 %vm755_vm0, %v1192_v23  ;;  %v1197_v40 = vmax.f32 %v1165_v31, 0.0 }
 0x1d8   : > { %v2378_v28 = vpop.f32.mrf.mxu1  ;;  %2408 = vmatprep.mubr.msk.f32.mxu1 %vm755_vm0, %v1193_v24 }
 0x1d9   : > { %v1195_v30 = vmax.f32 %v1157_v27, 0.0  ;;  %v1168_v38 = vadd.f32 %v2378_v28, %v2260_v21  ;;  %v1484_v14 = vpop.permute.xlu1 %1483 }
 0x1da   : > { %v1159_v20 = vpop.f32.mrf.mxu1 }
 0x1db   : > { %v1160_v26 = vadd.f32 %v2260_v21, %v1159_v20  ;;  %2409 = vmatmul.mubr.msk.f32.gmra.mxu1 %vm755_vm0, %v1194_v29  ;;  %v1198_v47 = vmax.f32 %v1168_v38, 0.0 }
 0x1dc   : > { %v2381_v36 = vpop.f32.mrf.mxu1  ;;  %2411 = vmatprep.mubr.msk.f32.mxu1 %vm755_vm0, %v1195_v30 }
 0x1dd   : > { %v1196_v39 = vmax.f32 %v1160_v26, 0.0  ;;  %v1181_v51 = vadd.f32 %v2381_v36, %v2260_v21  ;;  %v1495_v28 = vpop.permute.xlu1 %1494 }
 0x1de   : > { %v1172_v41 = vpop.f32.mrf.mxu1 }
 0x1df   : > { %v1173_v37 = vadd.f32 %v2260_v21, %v1172_v41  ;;  %2412 = vmatmul.mubr.msk.f32.gmra.mxu1 %vm755_vm0, %v1196_v39  ;;  %v1201_v60 = vmax.f32 %v1181_v51, 0.0  ;;  %v2021_v41 = vld [vmem:[%s3382_s12] sm:$0xff] }
 0x1e0   : > { %v2382_v42 = vpop.f32.mrf.mxu1  ;;  %2414 = vmatprep.mubr.msk.f32.mxu1 %vm755_vm0, %v1197_v40  ;;  %v2022_v40 = vld [vmem:[%s3382_s12 + $0x8] sm:$0xff] }
 0x1e1   : > { %v1199_v49 = vmax.f32 %v1173_v37, 0.0  ;;  %v1184_v59 = vadd.f32 %v2382_v42, %v2260_v21  ;;  %2424 = vmatpush3.msra.mxu0 %v2022_v40 }
 0x1e2   : > { %v1175_v53 = vpop.f32.mrf.mxu1  ;;  %2425 = vmatprep.subr.mxu0 %v2614_v5 }
 0x1e3   : > { %v1176_v54 = vadd.f32 %v2260_v21, %v1175_v53  ;;  %2415 = vmatmul.mubr.msk.f32.gmra.mxu1 %vm755_vm0, %v1198_v47  ;;  %v1202_v61 = vmax.f32 %v1184_v59, 0.0  ;;  %v1458_v21 = vpop.permute.xlu0 %1457  ;;  %v1506_v59 = vpop.permute.xlu1 %1505  ;;  %2426 = vmatpush3.msra.mxu0 %v2021_v41 }
 0x1e4   : > { %2417 = vmatprep.mubr.msk.f32.mxu1 %vm755_vm0, %v1199_v49 }
 0x1e5   : > { %v1200_v6 = vmax.f32 %v1176_v54, 0.0 }
 0x1e7   : > { %2418 = vmatmul.mubr.msk.f32.gmra.mxu1 %vm755_vm0, %v1200_v6  ;;  %v1462_v9 = vpop.permute.xlu0 %1461 }
 0x1e8   : > { %2420 = vmatprep.mubr.msk.f32.mxu1 %vm755_vm0, %v1201_v60 }
 0x1eb   : > { %2421 = vmatmul.mubr.msk.f32.gmra.mxu1 %vm755_vm0, %v1202_v61  ;;  %v1480_v22 = vpop.permute.xlu0 %1479 }
 0x1ef   : > { %v1491_v26 = vpop.permute.xlu0 %1490 }
 0x28f   : > { %v2401_v52 = vpop.f32.mrf.mxu1 }
 0x290   : > { %v1362_v29 = vadd.f32 %v2401_v52, %v3058_v8 }
 0x291   : > { %v1356_v10 = vpop.f32.mrf.mxu1 }
 0x292   : > { %v1357_v24 = vadd.f32 %v3058_v8, %v1356_v10  ;;  %v1436_v47 = vmax.f32 %v1362_v29, 0.0 }
 0x293   : > { %v2404_v16 = vpop.f32.mrf.mxu1 }
 0x294   : > { %v1372_v25 = vadd.f32 %v2404_v16, %v3058_v8  ;;  %v1435_v36 = vmax.f32 %v1357_v24, 0.0  ;;  %v1502_v16 = vpop.permute.xlu0 %1501 }
 0x295   : > { %v1366_v23 = vpop.f32.mrf.mxu1 }
 0x296   : > { %v1367_v27 = vadd.f32 %v3058_v8, %v1366_v23  ;;  %v1438_v38 = vmax.f32 %v1372_v25, 0.0  ;;  %v3075_v6 = vadd.f32 %v1458_v21, %v1435_v36 }
 0x297   : > { %v2407_v31 = vpop.f32.mrf.mxu1 }
 0x298   : > { %v1437_v30 = vmax.f32 %v1367_v27, 0.0  ;;  %v1382_v20 = vadd.f32 %v2407_v31, %v3058_v8  ;;  %v3077_v60 = vadd.f32 %v1473_v50, %v1438_v38  ;;  %v1557_v50 = vsel %vm552_vm1, %v3075_v6, -inf }
 0x299   : > { %v1376_v39 = vpop.f32.mrf.mxu1 }
 0x29a   : > { %v1440_v37 = vmax.f32 %v1382_v20, 0.0  ;;  %v1377_v42 = vadd.f32 %v3058_v8, %v1376_v39  ;;  %v3072_v49 = vadd.f32 %v1469_v7, %v1437_v30  ;;  %v3082_v7 = vadd.f32 %v1462_v9, %v1436_v47  ;;  %v1517_v20 = vpop.permute.xlu1 %1516 }
 0x29b   : > { %v2410_v51 = vpop.f32.mrf.mxu1 }
 0x29c   : > { %v1439_v53 = vmax.f32 %v1377_v42, 0.0  ;;  %v1392_v54 = vadd.f32 %v2410_v51, %v3058_v8  ;;  %v3079_v52 = vadd.f32 %v1484_v14, %v1440_v37  ;;  %v1566_v5 = vsel %vm552_vm1, %v3072_v49, -inf  ;;  %v1513_v42 = vpop.permute.xlu0 %1512 }
 0x29d   : > { %v1386_v61 = vpop.f32.mrf.mxu1  ;;  %v1567_v14 = vsel %vm552_vm1, %v3077_v60, -inf  ;;  %v1558_v36 = vsel %vm552_vm1, %v3082_v7, -inf }
 0x29e   : > { %v1442_v62 = vmax.f32 %v1392_v54, 0.0  ;;  %v1387_v10 = vadd.f32 %v3058_v8, %v1386_v61  ;;  %v3086_v23 = vadd.f32 %v1480_v22, %v1439_v53  ;;  %v1568_v30 = vmax.f32 %v1566_v5, %v1567_v14 }
 0x29f   : > { %v2413_v24 = vpop.f32.mrf.mxu1  ;;  %v1576_v22 = vsel %vm552_vm1, %v3079_v52, -inf  ;;  %v1559_v37 = vmax.f32 %v1557_v50, %v1558_v36 }
 0x2a0   : > { %v1441_v25 = vmax.f32 %v1387_v10, 0.0  ;;  %v1402_v21 = vadd.f32 %v2413_v24, %v3058_v8  ;;  %v1575_v27 = vsel %vm552_vm1, %v3086_v23, -inf  ;;  %v3095_v9 = vadd.f32 %v1495_v28, %v1442_v62 }
 0x2a1   : > { %v1396_v29 = vpop.f32.mrf.mxu1  ;;  %v1577_v38 = vmax.f32 %v1575_v27, %v1576_v22  ;;  %v1569_v62 = vrot.slane %v1568_v30, 4  ;;  %v1560_v50 = vrot.slane %v1559_v37, 4 }
 0x2a2   : > { %v1444_v31 = vmax.f32 %v1402_v21, 0.0  ;;  %v1397_v39 = vadd.f32 %v3058_v8, %v1396_v29  ;;  %v3102_v40 = vadd.f32 %v1491_v26, %v1441_v25  ;;  %v1585_v47 = vsel %vm552_vm1, %v3095_v9, -inf  ;;  %v1528_v29 = vpop.permute.xlu1 %1527 }
 0x2a3   : > { %v2416_v41 = vpop.f32.mrf.mxu1  ;;  %v1578_v26 = vrot.slane %v1577_v38, 4  ;;  %v1561_v4 = vmax.f32 %v1559_v37, %v1560_v50 }
 0x2a4   : > { %v1412_v28 = vadd.f32 %v2416_v41, %v3058_v8  ;;  %v1443_v51 = vmax.f32 %v1397_v39, 0.0  ;;  %v1584_v53 = vsel %vm552_vm1, %v3102_v40, -inf  ;;  %v3109_v54 = vadd.f32 %v1506_v59, %v1444_v31 }
 0x2a5   : > { %v1406_v61 = vpop.f32.mrf.mxu1  ;;  %v1586_v10 = vmax.f32 %v1584_v53, %v1585_v47  ;;  %v1570_v41 = vmax.f32 %v1568_v30, %v1569_v62  ;;  %v1579_v47 = vmax.f32 %v1577_v38, %v1578_v26 }
 0x2a6   : > { %v1446_v5 = vmax.f32 %v1412_v28, 0.0  ;;  %v1407_v24 = vadd.f32 %v3058_v8, %v1406_v61  ;;  %v3112_v25 = vadd.f32 %v1502_v16, %v1443_v51  ;;  %v1594_v22 = vsel %vm552_vm1, %v3109_v54, -inf  ;;  %v1524_v16 = vpop.permute.xlu0 %1523 }
 0x2a7   : > { %v2419_v21 = vpop.f32.mrf.mxu1  ;;  %v1587_v14 = vrot.slane %v1586_v10, 4  ;;  %v1571_v26 = vrot.slane %v1570_v41, 2 }
 0x2a8   : > { %v1422_v27 = vadd.f32 %v2419_v21, %v3058_v8  ;;  %v1445_v59 = vmax.f32 %v1407_v24, 0.0  ;;  %v1593_v31 = vsel %vm552_vm1, %v3112_v25, -inf  ;;  %v3119_v36 = vadd.f32 %v1517_v20, %v1446_v5 }
 0x2a9   : > { %v1416_v39 = vpop.f32.mrf.mxu1  ;;  %v1595_v28 = vmax.f32 %v1593_v31, %v1594_v22  ;;  %v1588_v2 = vmax.f32 %v1586_v10, %v1587_v14  ;;  %v1539_v22 = vpop.permute.xlu1 %1538  ;;  %v1562_v14 = vrot.slane %v1561_v4, 2 }
 0x2aa   : > { %v1448_v51 = vmax.f32 %v1422_v27, 0.0  ;;  %v1417_v53 = vadd.f32 %v3058_v8, %v1416_v39  ;;  %v3122_v61 = vadd.f32 %v1513_v42, %v1445_v59  ;;  %v1603_v20 = vsel %vm552_vm1, %v3119_v36, -inf }
 0x2ab   : > { %v2422_v21 = vpop.f32.mrf.mxu1  ;;  %v1596_v57 = vrot.slane %v1595_v28, 4  ;;  %v1580_v59 = vrot.slane %v1579_v47, 2  ;;  %v1589_v31 = vrot.slane %v1588_v2, 2 }
 0x2ac   : > { %v1432_v24 = vadd.f32 %v2422_v21, %v3058_v8  ;;  %v1447_v5 = vmax.f32 %v1417_v53, 0.0  ;;  %v1602_v30 = vsel %vm552_vm1, %v3122_v61, -inf  ;;  %v3129_v62 = vadd.f32 %v1528_v29, %v1448_v51  ;;  %v1535_v21 = vpop.permute.xlu0 %1534 }
 0x2ad   : > { %v1426_v38 = vpop.f32.mrf.mxu1  ;;  %v1597_v27 = vmax.f32 %v1595_v28, %v1596_v57  ;;  %v1604_v42 = vmax.f32 %v1602_v30, %v1603_v20  ;;  %v1572_v20 = vmax.f32 %v1570_v41, %v1571_v26 }
 0x2ae   : > { %v1450_v37 = vmax.f32 %v1432_v24, 0.0  ;;  %v1427_v10 = vadd.f32 %v3058_v8, %v1426_v38  ;;  %v3132_v50 = vadd.f32 %v1524_v16, %v1447_v5  ;;  %v1612_v53 = vsel %vm552_vm1, %v3129_v62, -inf }
 0x2af   : > { %v1605_v39 = vrot.slane %v1604_v42, 4  ;;  %v1598_v29 = vrot.slane %v1597_v27, 2  ;;  %v1581_v8 = vmax.f32 %v1579_v47, %v1580_v59  ;;  %v1563_v5 = vmax.f32 %v1561_v4, %v1562_v14 }
 0x2b0   : > { %v1449_v51 = vmax.f32 %v1427_v10, 0.0  ;;  %v1611_v57 = vsel %vm552_vm1, %v3132_v50, -inf  ;;  %v3138_v28 = vadd.f32 %v1539_v22, %v1450_v37  ;;  %v1590_v38 = vmax.f32 %v1588_v2, %v1589_v31 }
 0x2b1   : > { %v1606_v24 = vmax.f32 %v1604_v42, %v1605_v39  ;;  %v1613_v30 = vmax.f32 %v1611_v57, %v1612_v53  ;;  %v1599_v32 = vmax.f32 %v1597_v27, %v1598_v29  ;;  %v1573_v17 = vrot.slane %v1572_v20, 1 }
 0x2b2   : > { %v3140_v16 = vadd.f32 %v1535_v21, %v1449_v51  ;;  %v1621_v18 = vsel %vm552_vm1, %v3138_v28, -inf  ;;  %v1582_v26 = vrot.slane %v1581_v8, 1  ;;  %v1564_v42 = vrot.slane %v1563_v5, 1 }
 0x2b3   : > { %v1607_v55 = vrot.slane %v1606_v24, 2  ;;  %v1614_v33 = vrot.slane %v1613_v30, 4  ;;  %v1591_v47 = vrot.slane %v1590_v38, 1  ;;  %v1600_v4 = vrot.slane %v1599_v32, 1 }
 0x2b4   : > { %v1620_v10 = vsel %vm552_vm1, %v3140_v16, -inf  ;;  %v1574_v2 = vmax.f32 %v1572_v20, %v1573_v17  ;;  %v1583_v53 = vmax.f32 %v1581_v8, %v1582_v26  ;;  %v1565_v21 = vmax.f32 %v1563_v5, %v1564_v42 }
 0x2b5   : > { %v1608_v22 = vmax.f32 %v1606_v24, %v1607_v55  ;;  %v1615_v37 = vmax.f32 %v1613_v30, %v1614_v33  ;;  %v1622_v41 = vmax.f32 %v1620_v10, %v1621_v18  ;;  %v1592_v29 = vmax.f32 %v1590_v38, %v1591_v47  ;;  %v1556_v38 = vld [vmem:[#allocation2] sm:$0xff] }
 0x2b6   : > { %v1601_v33 = vmax.f32 %v1599_v32, %v1600_v4  ;;  %v1638_v18 = vsel %vm1637_vm3, %v1574_v2, %v1565_v21 }
 0x2b7   : > { %v1616_v59 = vrot.slane %v1615_v37, 2  ;;  %v1623_v39 = vrot.slane %v1622_v41, 4  ;;  %v1609_v14 = vrot.slane %v1608_v22, 1  ;;  %v1640_v30 = vsel %vm1639_vm4, %v1583_v53, %v1638_v18 }
 0x2b8   : > { %v1642_v20 = vsel %vm1641_vm5, %v1592_v29, %v1640_v30 }
 0x2b9   : > { %v1617_v31 = vmax.f32 %v1615_v37, %v1616_v59  ;;  %v1624_v27 = vmax.f32 %v1622_v41, %v1623_v39  ;;  %v1610_v55 = vmax.f32 %v1608_v22, %v1609_v14  ;;  %v1644_v8 = vsel %vm1643_vm6, %v1601_v33, %v1642_v20 }
 0x2bb   : > { %v1618_v51 = vrot.slane %v1617_v31, 1  ;;  %v1625_v57 = vrot.slane %v1624_v27, 2  ;;  %v1646_v5 = vsel %vm1645_vm7, %v1610_v55, %v1644_v8 }
 0x2bd   : > { %v1626_v24 = vmax.f32 %v1624_v27, %v1625_v57  ;;  %v1619_v17 = vmax.f32 %v1617_v31, %v1618_v51 }
 0x2bf   : > { %v1627_v10 = vrot.slane %v1626_v24, 1  ;;  %v1648_v37 = vsel %vm1647_vm8, %v1619_v17, %v1646_v5 }
 0x2c1   : > { %v1628_v32 = vmax.f32 %v1626_v24, %v1627_v10 }
 0x2c3   : > { %v1650_v22 = vsel %vm1649_vm9, %v1628_v32, %v1648_v37 }
 0x2c4   : > { %v1652_v41 = vmax.f32 %v1556_v38, %v1650_v22 }
 0x2c6   : > { %v1657_v26 = vcombine.high %v1652_v41, %v1652_v41  ;;  %v1664_v42 = vrot.slane %v1652_v41, %v2772_v12  ;;  %2012 = vst.msk [vmem:[#allocation2] sm:$0xff] %vm552_vm1, %v1652_v41  ;;  %v1653_v4 = vsub.f32 %v1556_v38, %v1652_v41 }
 0x2c8   : > { %v1671_v47 = vrot.slane %v1657_v26, %v2772_v12  ;;  %v1672_v59 = vcombine.high %v1664_v42, %v1664_v42  ;;  %v1680_v39 = vrot.slane %v1664_v42, %v2772_v12  ;;  %v1654_v51 = vmul.f32 1.442695, %v1653_v4 }
 0x2ca   : > { %v1673_v2 = vcombine.high %v1671_v47, %v1671_v47  ;;  %v1694_v14 = vrot.slane %v1672_v59, %v2772_v12  ;;  %v1702_v31 = vcombine.high %v1680_v39, %v1680_v39  ;;  %v1709_v27 = vrot.slane %v1680_v39, %v2778_v15 }
 0x2cb   : > { %v1687_v53 = vrot.slane %v1671_v47, %v2772_v12  ;;  %2498 = vpow2.f32 %v1654_v51 }
 0x2cc   : > { %v1704_v21 = vcombine.high %v1694_v14, %v1694_v14  ;;  %v1713_v29 = vrot.slane %v1694_v14, %v2778_v15  ;;  %v1717_v57 = vrot.slane %v1702_v31, %v2778_v15  ;;  %v1701_v33 = vrot.slane %v1673_v2, %v2772_v12 }
 0x2cd   : > { %v1746_v55 = vsub.f32 %v3075_v6, %v1709_v27  ;;  %v1747_v24 = vsub.f32 %v3082_v7, %v1709_v27  ;;  %v1703_v20 = vcombine.high %v1687_v53, %v1687_v53  ;;  %v1725_v10 = vrot.slane %v1687_v53, %v2778_v15 }
 0x2ce   : > { %v1721_v18 = vrot.slane %v1704_v21, %v2778_v15  ;;  %v1748_v30 = vsub.f32 %v3072_v49, %v1713_v29  ;;  %v1749_v17 = vsub.f32 %v3077_v60, %v1713_v29  ;;  %v1750_v8 = vsub.f32 %v3086_v23, %v1717_v57 }
 0x2cf   : > { %v1751_v5 = vsub.f32 %v3079_v52, %v1717_v57  ;;  %v1705_v38 = vcombine.high %v1701_v33, %v1701_v33  ;;  %v1729_v12 = vrot.slane %v1701_v33, %v2778_v15  ;;  %v1762_v6 = vmul.f32 1.442695, %v1746_v55 }
 0x2d0   : > { %v1752_v32 = vsub.f32 %v3102_v40, %v1721_v18  ;;  %v1753_v7 = vsub.f32 %v3095_v9, %v1721_v18  ;;  %v1764_v37 = vmul.f32 1.442695, %v1747_v24  ;;  %v1766_v49 = vmul.f32 1.442695, %v1748_v30 }
 0x2d1   : > { %v1768_v22 = vmul.f32 1.442695, %v1749_v17  ;;  %v1733_v60 = vrot.slane %v1703_v20, %v2778_v15  ;;  %v1754_v41 = vsub.f32 %v3112_v25, %v1725_v10  ;;  %2500 = vpow2.f32 %v1762_v6  ;;  %v1794_v20 = vld [vmem:[#allocation3] sm:$0xff] }
 0x2d2   : > { %v1770_v23 = vmul.f32 1.442695, %v1750_v8  ;;  %v1755_v26 = vsub.f32 %v3109_v54, %v1725_v10  ;;  %2502 = vpow2.f32 %v1764_v37  ;;  %v1772_v52 = vmul.f32 1.442695, %v1751_v5  ;;  %v1886_v54 = vld [vmem:[%s3373_s3] sm:$0xff] }
 0x2d3   : > { %v1737_v42 = vrot.slane %v1705_v38, %v2778_v15  ;;  %v1756_v40 = vsub.f32 %v3122_v61, %v1729_v12  ;;  %2504 = vpow2.f32 %v1766_v49  ;;  %v1774_v47 = vmul.f32 1.442695, %v1752_v32  ;;  %v1887_v61 = vld [vmem:[%s3373_s3 + $0x8] sm:$0xff] }
 0x2d4   : > { %v1757_v9 = vsub.f32 %v3119_v36, %v1729_v12  ;;  %2506 = vpow2.f32 %v1768_v22  ;;  %v1776_v59 = vmul.f32 1.442695, %v1753_v7  ;;  %v1758_v39 = vsub.f32 %v3132_v50, %v1733_v60 }
 0x2d5   : > { %2508 = vpow2.f32 %v1770_v23  ;;  %v1778_v25 = vmul.f32 1.442695, %v1754_v41  ;;  %v1759_v4 = vsub.f32 %v3129_v62, %v1733_v60  ;;  %v1780_v15 = vmul.f32 1.442695, %v1755_v26 }
 0x2d6   : > { %2510 = vpow2.f32 %v1772_v52  ;;  %v1760_v36 = vsub.f32 %v3140_v16, %v1737_v42  ;;  %v1782_v2 = vmul.f32 1.442695, %v1756_v40  ;;  %v1761_v50 = vsub.f32 %v3138_v28, %v1737_v42 }
 0x2d7   : > { %2512 = vpow2.f32 %v1774_v47  ;;  %v1784_v14 = vmul.f32 1.442695, %v1757_v9  ;;  %v1890_v31 = vadd.f32 %v1886_v54, %v1012_v63  ;;  %v1786_v27 = vmul.f32 1.442695, %v1758_v39 }
 0x2d8   : > { %2514 = vpow2.f32 %v1776_v59  ;;  %v1891_v62 = vadd.f32 %v1887_v61, %v1013_v0  ;;  %v1888_v53 = vadd.f32 %v1886_v54, %v1010_v11  ;;  %v1788_v21 = vmul.f32 1.442695, %v1759_v4  ;;  %v3196_v16 = vpop.eup %2498 }
 0x2d9   : > { %2516 = vpow2.f32 %v1778_v25  ;;  %v1889_v28 = vadd.f32 %v1887_v61, %v1011_v13  ;;  %v1894_v29 = vadd.f32 %v1886_v54, %v1016_v43  ;;  %v1790_v63 = vmul.f32 1.442695, %v1760_v36 }
 0x2da   : > { %2518 = vpow2.f32 %v1780_v15  ;;  %v1895_v51 = vadd.f32 %v1887_v61, %v1017_v44  ;;  %v1892_v56 = vadd.f32 %v1886_v54, %v1014_v45  ;;  %v1792_v0 = vmul.f32 1.442695, %v1761_v50 }
 0x2db   : > { %2520 = vpow2.f32 %v1782_v2  ;;  %v1893_v11 = vadd.f32 %v1887_v61, %v1015_v46  ;;  %v3406_v57 = vunpack.c.l.bf16 %v2946_v3  ;;  %v3407_v13 = vunpack.c.h.bf16 %v2946_v3 }
 0x2dc   : > { %2522 = vpow2.f32 %v1784_v14  ;;  %v1896_v44 = vadd.f32 %v1886_v54, %v3408_v34  ;;  %v3409_v45 = vunpack.c.h.bf16 %v2953_v19  ;;  %v3224_v46 = vadd.f32 %v1886_v54, %v3410_v35 }
 0x2dd   : > { %v3210_v1 = vadd.f32 %v1886_v54, %v3406_v57  ;;  %v3214_v43 = vadd.f32 %v1887_v61, %v3407_v13  ;;  %2524 = vpow2.f32 %v1786_v27  ;;  %v3411_v24 = vunpack.c.h.bf16 %v2984_v48 }
 0x2de   : > { %v2501_v33 = vpop.eup %2500  ;;  %v3220_v18 = vadd.f32 %v1887_v61, %v3409_v45  ;;  %2526 = vpow2.f32 %v1788_v21  ;;  %v3412_v19 = vunpack.c.l.bf16 %v2990_v58  ;;  %v3413_v32 = vunpack.c.h.bf16 %v2990_v58 }
 0x2df   : > { %v2503_v55 = vpop.eup %2502  ;;  %v3228_v3 = vadd.f32 %v1887_v61, %v3411_v24  ;;  %2528 = vpow2.f32 %v1790_v63  ;;  %v1796_v30 = vsel %vm552_vm1, %v2501_v33, 0.0  ;;  %v1904_v17 = vmul.f32 %v2501_v33, %v1888_v53 }
 0x2e0   : > { %v2505_v10 = vpop.eup %2504  ;;  %v3233_v8 = vadd.f32 %v1886_v54, %v3412_v19  ;;  %2530 = vpow2.f32 %v1792_v0  ;;  %v1797_v5 = vsel %vm552_vm1, %v2503_v55, 0.0  ;;  %v1905_v38 = vmul.f32 %v2503_v55, %v1889_v28 }
 0x2e1   : > { %v2507_v12 = vpop.eup %2506  ;;  %v3238_v48 = vadd.f32 %v1887_v61, %v3413_v32  ;;  %v1798_v6 = vadd.f32 %v1797_v5, %v1796_v30  ;;  %v1805_v7 = vsel %vm552_vm1, %v2505_v10, 0.0  ;;  %v1922_v37 = vsel %vm552_vm1, %v1904_v17, 0.0 }
 0x2e2   : > { %v2509_v49 = vpop.eup %2508  ;;  %v1806_v22 = vsel %vm552_vm1, %v2507_v12, 0.0  ;;  %v1906_v60 = vmul.f32 %v2505_v10, %v1890_v31  ;;  %v1923_v41 = vsel %vm552_vm1, %v1905_v38, 0.0  ;;  %v3245_v23 = vmul.f32 %v3196_v16, %v1794_v20 }
 0x2e3   : > { %v2511_v26 = vpop.eup %2510  ;;  %v1799_v52 = vrot.slane %v1798_v6, 4  ;;  %v1807_v42 = vadd.f32 %v1806_v22, %v1805_v7  ;;  %v1814_v58 = vsel %vm552_vm1, %v2509_v49, 0.0  ;;  %v3248_v40 = vmul.f32 %v2507_v12, %v1891_v62 }
 0x2e4   : > { %v2513_v47 = vpop.eup %2512  ;;  %v1815_v9 = vsel %vm552_vm1, %v2511_v26, 0.0  ;;  %v3251_v59 = vmul.f32 %v2509_v49, %v1892_v56  ;;  %v3253_v39 = vmul.f32 %v2511_v26, %v1893_v11  ;;  %v3255_v25 = vadd.f32 %v1923_v41, %v1922_v37 }
 0x2e5   : > { %v2515_v54 = vpop.eup %2514  ;;  %v1800_v4 = vadd.f32 %v1799_v52, %v1798_v6  ;;  %v1808_v15 = vrot.slane %v1807_v42, 4  ;;  %v1816_v61 = vadd.f32 %v1815_v9, %v1814_v58  ;;  %v1823_v36 = vsel %vm552_vm1, %v2513_v47, 0.0 }
 0x2e6   : > { %v2517_v2 = vpop.eup %2516  ;;  %v1824_v50 = vsel %vm552_vm1, %v2515_v54, 0.0  ;;  %v3259_v14 = vmul.f32 %v2513_v47, %v1894_v29  ;;  %v3261_v31 = vmul.f32 %v2515_v54, %v1895_v51  ;;  %v3264_v27 = vsel %vm552_vm1, %v1906_v60, 0.0 }
 0x2e7   : > { %v2519_v62 = vpop.eup %2518  ;;  %v1801_v53 = vrot.slane %v1800_v4, 2  ;;  %v1809_v21 = vadd.f32 %v1808_v15, %v1807_v42  ;;  %v1817_v28 = vrot.slane %v1816_v61, 4  ;;  %v1825_v63 = vadd.f32 %v1824_v50, %v1823_v36 }
 0x2e8   : > { %v2521_v56 = vpop.eup %2520  ;;  %v1832_v0 = vsel %vm552_vm1, %v2517_v2, 0.0  ;;  %v1833_v11 = vsel %vm552_vm1, %v2519_v62, 0.0  ;;  %v3268_v57 = vmul.f32 %v2517_v2, %v1896_v44  ;;  %v1925_v29 = vrot.slane %v3255_v25, 4 }
 0x2e9   : > { %v2523_v13 = vpop.eup %2522  ;;  %v1802_v51 = vadd.f32 %v1801_v53, %v1800_v4  ;;  %v1810_v33 = vrot.slane %v1809_v21, 2  ;;  %v1818_v34 = vadd.f32 %v1817_v28, %v1816_v61  ;;  %v1826_v45 = vrot.slane %v1825_v63, 4 }
 0x2ea   : > { %v2525_v35 = vpop.eup %2524  ;;  %v1834_v55 = vadd.f32 %v1833_v11, %v1832_v0  ;;  %v1841_v24 = vsel %vm552_vm1, %v2521_v56, 0.0  ;;  %v1842_v30 = vsel %vm552_vm1, %v2523_v13, 0.0  ;;  %v3274_v17 = vmul.f32 %v2519_v62, %v3220_v18 }
 0x2eb   : > { %v2527_v20 = vpop.eup %2526  ;;  %v1803_v10 = vrot.slane %v1802_v51, 1  ;;  %v1811_v44 = vadd.f32 %v1810_v33, %v1809_v21  ;;  %v1819_v19 = vrot.slane %v1818_v34, 2  ;;  %v1827_v5 = vadd.f32 %v1826_v45, %v1825_v63 }
 0x2ec   : > { %v2529_v38 = vpop.eup %2528  ;;  %v1835_v12 = vrot.slane %v1834_v55, 4  ;;  %v1843_v32 = vadd.f32 %v1842_v30, %v1841_v24  ;;  %v1850_v6 = vsel %vm552_vm1, %v2525_v35, 0.0  ;;  %v1851_v7 = vsel %vm552_vm1, %v2527_v20, 0.0 }
 0x2ed   : > { %v2531_v37 = vpop.eup %2530  ;;  %v1804_v49 = vadd.f32 %v1803_v10, %v1802_v51  ;;  %v1812_v22 = vrot.slane %v1811_v44, 1  ;;  %v1820_v60 = vadd.f32 %v1819_v19, %v1818_v34  ;;  %v1828_v41 = vrot.slane %v1827_v5, 2 }
 0x2ee   : > { %v1836_v26 = vadd.f32 %v1835_v12, %v1834_v55  ;;  %v1844_v18 = vrot.slane %v1843_v32, 4  ;;  %v1852_v52 = vadd.f32 %v1851_v7, %v1850_v6  ;;  %v1859_v42 = vsel %vm552_vm1, %v2529_v38, 0.0 }
 0x2ef   : > { %v1813_v58 = vadd.f32 %v1812_v22, %v1811_v44  ;;  %v1821_v47 = vrot.slane %v1820_v60, 1  ;;  %v1829_v9 = vadd.f32 %v1828_v41, %v1827_v5  ;;  %v1860_v54 = vsel %vm552_vm1, %v2531_v37, 0.0 }
 0x2f0   : > { %v1837_v4 = vrot.slane %v1836_v26, 2  ;;  %v1845_v15 = vadd.f32 %v1844_v18, %v1843_v32  ;;  %v1853_v61 = vrot.slane %v1852_v52, 4  ;;  %v1861_v36 = vadd.f32 %v1860_v54, %v1859_v42 }
 0x2f1   : > { %v1822_v2 = vadd.f32 %v1821_v47, %v1820_v60  ;;  %v1830_v50 = vrot.slane %v1829_v9, 1  ;;  %v1876_v62 = vsel %vm1637_vm3, %v1813_v58, %v1804_v49  ;;  %v1914_v53 = vmul.f32 %v2521_v56, %v3210_v1 }
 0x2f2   : > { %v1838_v21 = vadd.f32 %v1837_v4, %v1836_v26  ;;  %v1846_v28 = vrot.slane %v1845_v15, 2  ;;  %v1854_v63 = vadd.f32 %v1853_v61, %v1852_v52  ;;  %v1862_v0 = vrot.slane %v1861_v36, 4 }
 0x2f3   : > { %v1831_v11 = vadd.f32 %v1830_v50, %v1829_v9  ;;  %v1877_v51 = vsel %vm1639_vm4, %v1822_v2, %v1876_v62  ;;  %v1915_v33 = vmul.f32 %v2523_v13, %v3214_v43  ;;  %v1916_v34 = vmul.f32 %v2525_v35, %v3233_v8 }
 0x2f4   : > { %v1839_v45 = vrot.slane %v1838_v21, 1  ;;  %v1847_v55 = vadd.f32 %v1846_v28, %v1845_v15  ;;  %v1855_v24 = vrot.slane %v1854_v63, 2  ;;  %v1863_v30 = vadd.f32 %v1862_v0, %v1861_v36 }
 0x2f5   : > { %v1878_v10 = vsel %vm1641_vm5, %v1831_v11, %v1877_v51  ;;  %v1917_v44 = vmul.f32 %v2527_v20, %v3238_v48  ;;  %v1918_v1 = vmul.f32 %v2529_v38, %v3224_v46  ;;  %v1926_v56 = vadd.f32 %v1925_v29, %v3255_v25 }
 0x2f6   : > { %v1840_v19 = vadd.f32 %v1839_v45, %v1838_v21  ;;  %v1848_v5 = vrot.slane %v1847_v55, 1  ;;  %v1856_v12 = vadd.f32 %v1855_v24, %v1854_v63  ;;  %v1864_v32 = vrot.slane %v1863_v30, 2 }
 0x2f7   : > { %v1927_v6 = vrot.slane %v1926_v56, 2  ;;  %v1932_v43 = vsel %vm552_vm1, %v3248_v40, 0.0  ;;  %v1940_v8 = vsel %vm552_vm1, %v3251_v59, 0.0  ;;  %v1941_v13 = vsel %vm552_vm1, %v3253_v39, 0.0 }
 0x2f8   : > { %v1849_v35 = vadd.f32 %v1848_v5, %v1847_v55  ;;  %v1857_v48 = vrot.slane %v1856_v12, 1  ;;  %v1865_v20 = vadd.f32 %v1864_v32, %v1863_v30  ;;  %v1879_v46 = vsel %vm1643_vm6, %v1840_v19, %v1878_v10 }
 0x2f9   : > { %v1928_v25 = vadd.f32 %v1927_v6, %v1926_v56  ;;  %v1933_v29 = vadd.f32 %v1932_v43, %v3264_v27  ;;  %v1942_v38 = vadd.f32 %v1941_v13, %v1940_v8  ;;  %v1949_v7 = vsel %vm552_vm1, %v3259_v14, 0.0 }
 0x2fa   : > { %v1858_v49 = vadd.f32 %v1857_v48, %v1856_v12  ;;  %v1866_v40 = vrot.slane %v1865_v20, 1  ;;  %v1880_v22 = vsel %vm1645_vm7, %v1849_v35, %v1879_v46  ;;  %v1950_v59 = vsel %vm552_vm1, %v3261_v31, 0.0 }
 0x2fb   : > { %v1919_v39 = vmul.f32 %v2531_v37, %v3228_v3  ;;  %v1934_v60 = vrot.slane %v1933_v29, 4  ;;  %v1943_v41 = vrot.slane %v1942_v38, 4  ;;  %v1951_v26 = vadd.f32 %v1950_v59, %v1949_v7 }
 0x2fc   : > { %v1867_v18 = vadd.f32 %v1866_v40, %v1865_v20  ;;  %v1881_v52 = vsel %vm1647_vm8, %v1858_v49, %v1880_v22  ;;  %v1958_v27 = vsel %vm552_vm1, %v3268_v57, 0.0  ;;  %v1959_v14 = vsel %vm552_vm1, %v3274_v17, 0.0 }
 0x2fd   : > { %v1929_v42 = vrot.slane %v1928_v25, 1  ;;  %v1935_v58 = vadd.f32 %v1934_v60, %v1933_v29  ;;  %v1944_v47 = vadd.f32 %v1943_v41, %v1942_v38  ;;  %v1952_v9 = vrot.slane %v1951_v26, 4 }
 0x2fe   : > { %v1882_v31 = vsel %vm1649_vm9, %v1867_v18, %v1881_v52  ;;  %v1960_v54 = vadd.f32 %v1959_v14, %v1958_v27  ;;  %v1967_v3 = vsel %vm552_vm1, %v1914_v53, 0.0  ;;  %v1968_v37 = vsel %vm552_vm1, %v1915_v33, 0.0  ;;  %v1920_v52 = vld [vmem:[#allocation4] sm:$0xff] }
 0x2ff   : > { %v1936_v4 = vrot.slane %v1935_v58, 2  ;;  %v1945_v15 = vrot.slane %v1944_v47, 2  ;;  %v1953_v61 = vadd.f32 %v1952_v9, %v1951_v26  ;;  %v1969_v36 = vadd.f32 %v1968_v37, %v1967_v3  ;;  %v2287_v3 = vld [vmem:[%s3383_s13] ss:$0 sm:$0xff] }
 0x300   : > { %v1961_v2 = vrot.slane %v1960_v54, 4  ;;  %v1976_v57 = vsel %vm552_vm1, %v1916_v34, 0.0  ;;  %v1977_v17 = vsel %vm552_vm1, %v1917_v44, 0.0  ;;  %v1985_v50 = vsel %vm552_vm1, %v1918_v1, 0.0 }
 0x301   : > { %v1937_v62 = vadd.f32 %v1936_v4, %v1935_v58  ;;  %v1946_v21 = vadd.f32 %v1945_v15, %v1944_v47  ;;  %v1954_v28 = vrot.slane %v1953_v61, 2  ;;  %v1970_v63 = vrot.slane %v1969_v36, 4 }
 0x302   : > { %v1962_v0 = vadd.f32 %v1961_v2, %v1960_v54  ;;  %v1978_v11 = vadd.f32 %v1977_v17, %v1976_v57  ;;  %v1986_v53 = vsel %vm552_vm1, %v1919_v39, 0.0  ;;  %v1884_v51 = vadd.f32 %v1882_v31, %v3245_v23 }
 0x303   : > { %v1938_v33 = vrot.slane %v1937_v62, 1  ;;  %v1947_v45 = vrot.slane %v1946_v21, 1  ;;  %v1955_v55 = vadd.f32 %v1954_v28, %v1953_v61  ;;  %v1971_v24 = vadd.f32 %v1970_v63, %v1969_v36 }
 0x304   : > { %v1930_v30 = vadd.f32 %v1929_v42, %v1928_v25  ;;  %v1963_v34 = vrot.slane %v1962_v0, 2  ;;  %v1979_v10 = vrot.slane %v1978_v11, 4  ;;  %v1987_v44 = vadd.f32 %v1986_v53, %v1985_v50  ;;  %1885 = vst.msk [vmem:[#allocation3] sm:$0xff] %vm552_vm1, %v1884_v51 }
 0x305   : > { %v1939_v1 = vadd.f32 %v1938_v33, %v1937_v62  ;;  %v1948_v56 = vadd.f32 %v1947_v45, %v1946_v21  ;;  %v1956_v19 = vrot.slane %v1955_v55, 1  ;;  %v1972_v5 = vrot.slane %v1971_v24, 2 }
 0x306   : > { %v1964_v12 = vadd.f32 %v1963_v34, %v1962_v0  ;;  %v1980_v32 = vadd.f32 %v1979_v10, %v1978_v11  ;;  %v1988_v6 = vrot.slane %v1987_v44, 4  ;;  %v1921_v42 = vmul.f32 %v3196_v16, %v1920_v52 }
 0x307   : > { %v1957_v43 = vadd.f32 %v1956_v19, %v1955_v55  ;;  %v1973_v8 = vadd.f32 %v1972_v5, %v1971_v24  ;;  %v2002_v23 = vsel %vm1637_vm3, %v1939_v1, %v1930_v30 }
 0x308   : > { %v1965_v13 = vrot.slane %v1964_v12, 1  ;;  %v1981_v35 = vrot.slane %v1980_v32, 2  ;;  %v1989_v48 = vadd.f32 %v1988_v6, %v1987_v44  ;;  %v2003_v20 = vsel %vm1639_vm4, %v1948_v56, %v2002_v23 }
 0x309   : > { %v1974_v46 = vrot.slane %v1973_v8, 1  ;;  %v2004_v25 = vsel %vm1641_vm5, %v1957_v43, %v2003_v20 }
 0x30a   : > { %v1966_v29 = vadd.f32 %v1965_v13, %v1964_v12  ;;  %v1982_v38 = vadd.f32 %v1981_v35, %v1980_v32  ;;  %v1990_v7 = vrot.slane %v1989_v48, 2 }
 0x30b   : > { %v1975_v49 = vadd.f32 %v1974_v46, %v1973_v8  ;;  %v2017_v40 = vld [vmem:[#allocation3] sm:$0xff] }
 0x30c   : > { %v1983_v22 = vrot.slane %v1982_v38, 1  ;;  %v1991_v59 = vadd.f32 %v1990_v7, %v1989_v48  ;;  %v2005_v39 = vsel %vm1643_vm6, %v1966_v29, %v2004_v25  ;;  %v2018_v60 = vadd.f32 1e-16, %v2017_v40 }
 0x30d   : > { %v2006_v41 = vsel %vm1645_vm7, %v1975_v49, %v2005_v39 }
 0x30e   : > { %v1984_v26 = vadd.f32 %v1983_v22, %v1982_v38  ;;  %v1992_v18 = vrot.slane %v1991_v59, 1  ;;  %2532 = vrcp.f32 %v2018_v60 }
 0x310   : > { %v1993_v27 = vadd.f32 %v1992_v18, %v1991_v59  ;;  %v2007_v14 = vsel %vm1647_vm8, %v1984_v26, %v2006_v41 }
 0x312   : > { %v2008_v58 = vsel %vm1649_vm9, %v1993_v27, %v2007_v14 }
 0x313   : > { %v2010_v47 = vadd.f32 %v2008_v58, %v1921_v42 }
 0x315   : > { %2011 = vst.msk [vmem:[#allocation4] sm:$0xff] %vm552_vm1, %v2010_v47 }
 0x31b   : > { %v2533_v9 = vpop.eup %2532 }
 0x31c   : > { %v2016_v31 = vld [vmem:[#allocation4] sm:$0xff] }
 0x31d   : > { %v2020_v54 = vmul.f32 %v2533_v9, %v2016_v31 }
 0x31f   : > { %2428 = vmatmul.mubr.msk.f32.vlgmr.msra.gmra.mxu0 %vm552_vm1, %v2020_v54 }
 0x3df   : > { %v2099_v37 = vpop.f32.mrf.mxu0 }
 0x3e0   : > { %v2100_v16 = vadd.f32 %v2287_v3, %v2099_v37 }
 0x3e1   : > { %v2429_v4 = vpop.f32.mrf.mxu0 }
 0x3e2   : > { %v2103_v15 = vmax.f32 %v2100_v16, 0.0 }
 0x3e4   : > { %2104 = vst.msk [vmem:[%s523_s29] sm:$0xff] %vm552_vm1, %v2103_v15 }
 0x3e5   : > { %2547 = shalt.err (!%p2544_p5)
}
 0x3e6   : > { %s2548_s22 = scalar_lea.hbm %s2117_s28, 128  ;;  %s2552_s29 = scalar_lea.hbm %s3384_s14, 256 }
 0x3e7   : > { %p2549_p6 = scmp.ne.s32.totalorder %s2117_s28, %s2548_s22  ;;  %p2553_p10 = scmp.lt.s32.totalorder %s2117_s28, %s3384_s14 }
 0x3e8   : > { %p2554_p11 = scmp.lt.s32.totalorder %s2552_s29, %s2548_s22 }
 0x3e9   : > { %p2550_p7 = pnand %p2549_p6, %p2732_p4 }
 0x3ea   : > { %p2555_p12 = por %p2554_p11, %p2553_p10 }
 0x3eb   : > { %p2551_p9 = pneg %p2550_p7 }
 0x3ed   : > { %p2556_p13 = pnand %p2555_p12, %p2551_p9 }
 0x3ef   : > { %2559 = shalt.err (!%p2556_p13)
}
 0x3f0   : > { %2432 = dma.vmem_to_hbm [thread:$0]  (%p2732_p4), %s2120_s17, 128, %s2117_s28, %s2106_s0  }
 0x3f1 PF: > { %s3414_s1 = sld [smem:[#allocation8_spill]]  ;;  %p2438_p0 = scmp.ge.s32.totalorder %s2610_s18, 2 }
 0x3f3   : > { %p2435_p1 = pnand %p2438_p0, %p2739_p8 }
 0x3f5   : > { %p2436_p2 = pneg %p2435_p1 }
 0x3f7   : > { %s2131_s24 = sand.u32 1, %s3414_s1  }
 0x3f8   : > { %s2132_s16 = scalar_lea.sflag [#allocation6], %s2131_s24 }
 0x3f9   : > { %2585 = dma.done.wait (%p2436_p2), %s2132_s16, 128  }
 0x3fa   : > { %2587 = vsyncadd (%p2436_p2), %s2132_s16, 4294967168  ;;  %s27_s18 = sadd.s32 1, %s2610_s18   ;;  %s3415_s20 = sld [smem:[#allocation11_spill]] }
 0x3fb   : > { %p24_p3 = scmp.ge.s32.totalorder %s27_s18, 4   ;;  %s3416_s16 = sld [smem:[#allocation9_spill]] }
 0x3fc   : > { %s3417_s17 = sld [smem:[#allocation10_spill]]  ;;  %s3418_s29 = smov %s2594_s30 }
 0x3fd   : > { %s3419_s30 = smov %s2598_s15  ;;  %26 = sbr.rel (!%p24_p3) target bundleno = 7 (0x7), region = 130 }
 0x400   : > { %s3420_s15 = smov %s3415_s20 }
 0x402   :  { %2137 = vsyncpa [#allocation6], 1 }
 0x403   :  { %2139 = vsyncpa [#allocation6 + $0x1], 1 }

</bundles_post_ra>
